<compile_context>
chip_gen: v7x
topology: tpu7x:2x2x1
jax: 0.10.0
libtpu: 0.0.40
codegen_flags: <defaults>
</compile_context>

<pallas_src>
import functools
import math

import jax
import jax.numpy as jnp
from jax.experimental import pallas as pl
from jax.experimental.pallas import tpu as pltpu

_VMEM = pl.BlockSpec(memory_space=pltpu.MemorySpace.VMEM)
_BF16 = jnp.bfloat16
_OUT_LANES = 128          # lane-padded width of the kernel output block


# ----------------------------------------------------------------------------
# Fused forward kernel (whole DualHGCN.forward in one pallas_call)
# ----------------------------------------------------------------------------
def _make_dual_hgcn_kernel(D, Nu, Ni, h0, h1, use_wb, use_drop):
    DNu, DNi = D * Nu, D * Ni

    def dotf(a, b):
        # bf16 x bf16 MXU matmul, f32 accumulation.
        return jnp.dot(a, b, preferred_element_type=jnp.float32)

    def kernel(*refs):
        it = iter(refs)
        x1_ref = next(it)                             # (D*N, 2*D*F)   bf16  block-diag layer-1 features
        gh_ref = next(it)                             # (D*N, D*N)     bf16  [[Gu, Hi^T],[Hu^T, Gi]] blocks
        w1_ref = next(it)                             # (2*D*F, 2*h0)  bf16
        wb1_ref = next(it) if use_wb else None        # (2*h0, (D-1)*h0) bf16
        b1_ref = next(it)                             # (2*D, h0)      f32
        mask_ref = next(it) if use_drop else None     # (D*N, h0)      f32  inverted-dropout mask
        w2_ref = next(it)                             # (2*D*h0, 2*h1) bf16
        wb2_ref = next(it) if use_wb else None        # (2*h1, (D-1)*h1) bf16
        b2_ref = next(it)                             # (2*D, h1)      f32
        wlin_ref = next(it)                           # (2*D*h1, 128)  bf16  (zero-padded lanes)
        blin_ref = next(it)                           # (2, 128)       f32   (zero-padded lanes)
        out_ref = next(it)                            # (N, 128)       f32

        gh = gh_ref[...]
        gh_u = gh[:DNu]            # user-conv block rows (aligned sublane slice)
        gh_i = gh[DNu:]            # item-conv block rows

        def hyper_layer(proj, wb_ref, b_ref, h):
            """One MultiHyperConv layer on the stacked projections.

            proj: (D*N, 2*h) f32.  Columns [:h] are the user-conv operand
            ([Xu_d @ Wu_U, Xi_d @ Wi_U] stacked over dty), columns [h:] the
            item-conv operand.  Returns (D*N, h) f32 activations, rows ordered
            [user dty 0..D-1, item dty 0..D-1].
            """
            projb = proj.astype(_BF16)                # one cast per consumer group
            u_pre = dotf(gh_u, projb[:, :h])          # ALL D user convs in one dot
            i_pre = dotf(gh_i, projb[:, h:])          # ALL D item convs in one dot
            b = b_ref[...]
            base_u = jnp.maximum(u_pre[:Nu] + b[0][None, :], 0.0)
            base_i = jnp.maximum(i_pre[:Ni] + b[D][None, :], 0.0)
            if use_wb:
                wb = wb_ref[...]
                wb_u = dotf(base_u.astype(_BF16), wb[:h])   # all non-base WB terms, one dot
                wb_i = dotf(base_i.astype(_BF16), wb[h:])
            outs_u, outs_i = [base_u], [base_i]
            for d in range(1, D):
                tu = u_pre[d * Nu:(d + 1) * Nu] + b[d][None, :]
                ti = i_pre[d * Ni:(d + 1) * Ni] + b[D + d][None, :]
                if use_wb:
                    tu = tu + wb_u[:, (d - 1) * h:d * h]
                    ti = ti + wb_i[:, (d - 1) * h:d * h]
                outs_u.append(jnp.maximum(tu, 0.0))
                outs_i.append(jnp.maximum(ti, 0.0))
            return jnp.concatenate(outs_u + outs_i, axis=0)

        # ---- layer 1: ALL 2*D projections in one block-diagonal dot ----
        proj1 = dotf(x1_ref[...], w1_ref[...])               # (D*N, 2*h0) f32
        x1 = hyper_layer(proj1, wb1_ref, b1_ref, h0)         # (D*N, h0)

        # ---- inverted dropout (host-generated mask, single VPU multiply) ----
        if use_drop:
            x1 = x1 * mask_ref[...]

        # ---- layer 2: per-dty fat projection dots ----
        # TODO(synk): assembling a block-diagonal X2 in a zeroed VMEM scratch would
        # turn these 2*D dots into 1; at this size the assembly cost ~ the dots.
        x1b = x1.astype(_BF16)
        w2 = w2_ref[...]
        proj2_blocks = [dotf(x1b[d * Nu:(d + 1) * Nu], w2[d * h0:(d + 1) * h0])
                        for d in range(D)]
        proj2_blocks += [dotf(x1b[DNu + d * Ni:DNu + (d + 1) * Ni],
                              w2[D * h0 + d * h0:D * h0 + (d + 1) * h0])
                         for d in range(D)]
        proj2 = jnp.concatenate(proj2_blocks, axis=0)        # (D*N, 2*h1)
        x2 = hyper_layer(proj2, wb2_ref, b2_ref, h1)         # (D*N, h1)

        # ---- final Linear: per-dty accumulation (no lane concat), padded lanes ----
        x2b = x2.astype(_BF16)
        wlin = wlin_ref[...]
        blin = blin_ref[...]
        out_u = blin[0][None, :]
        out_i = blin[1][None, :]
        for d in range(D):
            out_u = out_u + dotf(x2b[d * Nu:(d + 1) * Nu],
                                 wlin[d * h1:(d + 1) * h1])
            out_i = out_i + dotf(x2b[DNu + d * Ni:DNu + (d + 1) * Ni],
                                 wlin[D * h1 + d * h1:D * h1 + (d + 1) * h1])
        # Single full-block, lane-dense (128-wide) unmasked store.
        out_ref[...] = jnp.concatenate([out_u, out_i], axis=0)

    return kernel


# ----------------------------------------------------------------------------
# Parameter initialization (mirrors the PyTorch reset_parameters / nn.Linear)
# ----------------------------------------------------------------------------
def init_hyperconv_params(key, in_ft, out_ft):
    stdv = 1.0 / math.sqrt(out_ft)
    k1, k2, k3, k4 = jax.random.split(key, 4)
    return {
        'Wu':   jax.random.uniform(k1, (in_ft, out_ft),  jnp.float32, -stdv, stdv),
        'Wi':   jax.random.uniform(k2, (in_ft, out_ft),  jnp.float32, -stdv, stdv),
        'bias': jax.random.uniform(k3, (out_ft,),        jnp.float32, -stdv, stdv),
        'WB':   jax.random.uniform(k4, (out_ft, out_ft), jnp.float32, -stdv, stdv),
    }


def init_multi_params(key, in_ft, out_ft, dty_nets):
    params = {'U': {}, 'I': {}}
    for side in ('U', 'I'):
        for dty in dty_nets:
            key, sub = jax.random.split(key)
            params[side][dty] = init_hyperconv_params(sub, in_ft, out_ft)
    return params, key


def init_linear_params(key, in_f, out_f):
    k1, k2 = jax.random.split(key)
    bound = 1.0 / math.sqrt(in_f)
    return {'W': jax.random.uniform(k1, (in_f, out_f), jnp.float32, -bound, bound),
            'b': jax.random.uniform(k2, (out_f,),      jnp.float32, -bound, bound)}


# ----------------------------------------------------------------------------
# Host-side operand packing + forward wrapper (one pallas_call per forward)
# ----------------------------------------------------------------------------
def dual_hgcn_forward(params, Xu, Xi, Gu, Gi, Hu, Hi, drop_mask=None,
                      *, dty_nets, inter, intra):
    """Fused DualHGCN forward.

    drop_mask: packed inverted-dropout mask of shape (D*(Nu+Ni), n_hid[0]) with
    values in {0, 1/(1-p)} (training mode), or None to disable dropout (eval).
    In a training loop, all parameter/graph packs below are static per step and
    could be hoisted out of the jitted step function.
    """
    assert dty_nets[0] == 'base'
    D = len(dty_nets)
    base = dty_nets[0]
    Nu, Ni = Gu[base].shape[0], Gi[base].shape[0]
    F = Xu[base].shape[1]
    h0 = params['mhc1']['U'][base]['Wu'].shape[1]
    h1 = params['mhc2']['U'][base]['Wu'].shape[1]
    hout = params['lin_u']['W'].shape[1]
    N = Nu + Ni
    DN, DNu = D * N, D * Nu
    use_wb = bool(intra) and D > 1
    use_drop = drop_mask is not None
    P = _OUT_LANES
    assert hout <= P

    # -- layer-1 block-diagonal feature matrix + block graph operator (bf16) --
    x1 = jnp.zeros((DN, 2 * D * F), _BF16)
    gh = jnp.zeros((DN, DN), _BF16)
    for d, dty in enumerate(dty_nets):
        ur = slice(d * Nu, (d + 1) * Nu)                  # user rows/cols of dty d
        ir = slice(DNu + d * Ni, DNu + (d + 1) * Ni)      # item rows/cols of dty d
        x1 = x1.at[ur, d * F:(d + 1) * F].set(Xu[dty].astype(_BF16))
        x1 = x1.at[ir, D * F + d * F:D * F + (d + 1) * F].set(Xi[dty].astype(_BF16))
        gh = gh.at[ur, ur].set(Gu[dty].astype(_BF16))
        gh = gh.at[ir, ir].set(Gi[dty].astype(_BF16))
        if inter:
            gh = gh.at[ur, ir].set(Hi[dty].T.astype(_BF16))
            gh = gh.at[ir, ur].set(Hu[dty].T.astype(_BF16))

    def pack_proj_w(layer):
        # Rows: user-feature blocks (dty 0..D-1) then item-feature blocks.
        # Columns [:h] feed the user conv, columns [h:] feed the item conv.
        rows = [jnp.concatenate([layer['U'][dty]['Wu'], layer['I'][dty]['Wi']], axis=1)
                for dty in dty_nets]
        rows += [jnp.concatenate([layer['U'][dty]['Wi'], layer['I'][dty]['Wu']], axis=1)
                 for dty in dty_nets]
        return jnp.concatenate(rows, axis=0).astype(_BF16)

    def pack_wb(layer):
        non_base = dty_nets[1:]
        wbu = jnp.concatenate([layer['U'][dty]['WB'] for dty in non_base], axis=1)
        wbi = jnp.concatenate([layer['I'][dty]['WB'] for dty in non_base], axis=1)
        return jnp.concatenate([wbu, wbi], axis=0).astype(_BF16)

    def pack_bias(layer):
        return jnp.concatenate(
            [jnp.stack([layer['U'][dty]['bias'] for dty in dty_nets]),
             jnp.stack([layer['I'][dty]['bias'] for dty in dty_nets])], axis=0)

    # Final Linear weights/bias, zero-padded to 128 output lanes (lane-dense store).
    wlin = jnp.zeros((2 * D * h1, P), jnp.float32)
    wlin = wlin.at[:D * h1, :hout].set(params['lin_u']['W'])
    wlin = wlin.at[D * h1:, :hout].set(params['lin_i']['W'])
    wlin = wlin.astype(_BF16)
    blin = jnp.zeros((2, P), jnp.float32)
    blin = blin.at[0, :hout].set(params['lin_u']['b'])
    blin = blin.at[1, :hout].set(params['lin_i']['b'])

    args = [x1, gh, pack_proj_w(params['mhc1'])]
    if use_wb:
        args.append(pack_wb(params['mhc1']))
    args.append(pack_bias(params['mhc1']))
    if use_drop:
        args.append(drop_mask.astype(jnp.float32))
    args.append(pack_proj_w(params['mhc2']))
    if use_wb:
        args.append(pack_wb(params['mhc2']))
    args += [pack_bias(params['mhc2']), wlin, blin]

    kernel = _make_dual_hgcn_kernel(D, Nu, Ni, h0, h1, use_wb, use_drop)
    out = pl.pallas_call(
        kernel,
        out_shape=jax.ShapeDtypeStruct((N, P), jnp.float32),
        in_specs=[_VMEM] * len(args),
        out_specs=_VMEM,
    )(*args)
    return out[:, :hout]


# ----------------------------------------------------------------------------
# Pure-JAX reference (mirrors the PyTorch forward; uses the same bf16 MXU
# operand precision so the comparison isolates packing / fusion logic)
# ----------------------------------------------------------------------------
def dual_hgcn_reference(params, Xu, Xi, Gu, Gi, Hu, Hi, drop_mask,
                        *, dty_nets, inter, intra):
    def mdot(a, b):
        return jnp.dot(a.astype(_BF16), b.astype(_BF16),
                       preferred_element_type=jnp.float32)

    D = len(dty_nets)
    base = dty_nets[0]
    Nu, Ni = Gu[base].shape[0], Gi[base].shape[0]

    def hyperconv(p, X_own, G_own, X_oth, H_oth, B, _intra):
        x_own = mdot(X_own, p['Wu'])
        x_oth = mdot(X_oth, p['Wi'])
        X = mdot(G_own, x_own)
        if inter:
            X = X + mdot(H_oth.T, x_oth)
        if intra and _intra:
            X = X + mdot(B, p['WB'])
        return jnp.maximum(X + p['bias'][None, :], 0.0)

    def multi(layer, Xu_d, Xi_d):
        out_u, out_i = {}, {}
        out_u[base] = hyperconv(layer['U'][base], Xu_d[base], Gu[base],
                                Xi_d[base], Hi[base], None, False)
        out_i[base] = hyperconv(layer['I'][base], Xi_d[base], Gi[base],
                                Xu_d[base], Hu[base], None, False)
        for dty in dty_nets[1:]:
            out_u[dty] = hyperconv(layer['U'][dty], Xu_d[dty], Gu[dty],
                                   Xi_d[dty], Hi[dty], out_u[base], True)
            out_i[dty] = hyperconv(layer['I'][dty], Xi_d[dty], Gi[dty],
                                   Xu_d[dty], Hu[dty], out_i[base], True)
        return out_u, out_i

    xu1, xi1 = multi(params['mhc1'], Xu, Xi)
    if drop_mask is not None:
        DNu = D * Nu
        xu1 = {dty: xu1[dty] * drop_mask[d * Nu:(d + 1) * Nu]
               for d, dty in enumerate(dty_nets)}
        xi1 = {dty: xi1[dty] * drop_mask[DNu + d * Ni:DNu + (d + 1) * Ni]
               for d, dty in enumerate(dty_nets)}
    xu2, xi2 = multi(params['mhc2'], xu1, xi1)
    all_u = jnp.concatenate([xu2[dty] for dty in dty_nets], axis=1)
    all_i = jnp.concatenate([xi2[dty] for dty in dty_nets], axis=1)
    opt_u = mdot(all_u, params['lin_u']['W']) + params['lin_u']['b'][None, :]
    opt_i = mdot(all_i, params['lin_i']['W']) + params['lin_i']['b'][None, :]
    return jnp.concatenate([opt_u, opt_i], axis=0)


# ----------------------------------------------------------------------------
# Driver
# ----------------------------------------------------------------------------
if __name__ == "__main__":
    key = jax.random.PRNGKey(0)

    Nu, Ni = 16, 24            # number of user / item nodes
    in_ch = 8                  # input feature dim
    n_hid = [32, 16]           # hidden dims of the two MultiHyperConv layers
    dty_nets = ('base', 'A', 'B')
    inter, intra = True, True
    dropout_p = 0.5

    # ---- parameters ----
    params = {}
    params['mhc1'], key = init_multi_params(key, in_ch,    n_hid[0], dty_nets)
    params['mhc2'], key = init_multi_params(key, n_hid[0], n_hid[1], dty_nets)
    key, k_lu, k_li = jax.random.split(key, 3)
    params['lin_u'] = init_linear_params(k_lu, n_hid[-1] * len(dty_nets), n_hid[-1])
    params['lin_i'] = init_linear_params(k_li, n_hid[-1] * len(dty_nets), n_hid[-1])

    # ---- inputs ----
    Xu, Xi, Gu, Gi, Hu, Hi = {}, {}, {}, {}, {}, {}
    for dty in dty_nets:
        key, k1, k2, k3, k4, k5, k6 = jax.random.split(key, 7)
        Xu[dty] = jax.random.normal(k1, (Nu, in_ch), jnp.float32)
        Xi[dty] = jax.random.normal(k2, (Ni, in_ch), jnp.float32)
        Gu[dty] = jax.random.normal(k3, (Nu, Nu), jnp.float32)
        Gi[dty] = jax.random.normal(k4, (Ni, Ni), jnp.float32)
        Hu[dty] = jax.random.normal(k5, (Nu, Ni), jnp.float32)   # user-side incidence
        Hi[dty] = jax.random.normal(k6, (Ni, Nu), jnp.float32)   # item-side incidence

    # ---- host-generated inverted-dropout mask (F.dropout training semantics) ----
    key, k_drop = jax.random.split(key)
    keep = 1.0 - dropout_p
    D = len(dty_nets)
    drop_mask = (jax.random.bernoulli(k_drop, keep, (D * (Nu + Ni), n_hid[0]))
                 .astype(jnp.float32) / keep)

    fwd = jax.jit(functools.partial(dual_hgcn_forward, dty_nets=dty_nets,
                                    inter=inter, intra=intra))
    out = jax.block_until_ready(fwd(params, Xu, Xi, Gu, Gi, Hu, Hi, drop_mask))

    assert out.shape == (Nu + Ni, n_hid[-1]), out.shape
    assert out.dtype == jnp.float32

    # ---- correctness check vs. a pure-JAX reference with matching MXU precision ----
    ref = dual_hgcn_reference(params, Xu, Xi, Gu, Gi, Hu, Hi, drop_mask,
                              dty_nets=dty_nets, inter=inter, intra=intra)
    err = float(jnp.max(jnp.abs(out - ref)))
    scale = float(jnp.max(jnp.abs(ref)))
    assert err <= 5e-3 * (1.0 + scale), (err, scale)

    print("KERNEL_OK")
</pallas_src>

<mosaic_0001>
module attributes {stable_mosaic.version = 11 : i64} {
  func.func @kernel(%arg0: memref<120x48xbf16, #tpu.memory_space<vmem>>, %arg1: memref<120x120xbf16, #tpu.memory_space<vmem>>, %arg2: memref<48x64xbf16, #tpu.memory_space<vmem>>, %arg3: memref<64x64xbf16, #tpu.memory_space<vmem>>, %arg4: memref<6x32xf32, #tpu.memory_space<vmem>>, %arg5: memref<120x32xf32, #tpu.memory_space<vmem>>, %arg6: memref<192x32xbf16, #tpu.memory_space<vmem>>, %arg7: memref<32x32xbf16, #tpu.memory_space<vmem>>, %arg8: memref<6x16xf32, #tpu.memory_space<vmem>>, %arg9: memref<96x128xbf16, #tpu.memory_space<vmem>>, %arg10: memref<2x128xf32, #tpu.memory_space<vmem>>, %arg11: memref<40x128xf32, #tpu.memory_space<vmem>>) attributes {dimension_semantics = [], scalar_prefetch = 0 : i64, scratch_operands = 0 : i64, tpu.core_type = #tpu.core_type<tc>} {
    %c0 = arith.constant 0 : index
    %c0_0 = arith.constant 0 : index
    %0 = vector.load %arg1[%c0, %c0_0] : memref<120x120xbf16, #tpu.memory_space<vmem>>, vector<120x120xbf16>
    %1 = vector.extract_strided_slice %0 {offsets = [0, 0], sizes = [48, 120], strides = [1, 1]} : vector<120x120xbf16> to vector<48x120xbf16>
    %2 = vector.extract_strided_slice %0 {offsets = [48, 0], sizes = [72, 120], strides = [1, 1]} : vector<120x120xbf16> to vector<72x120xbf16>
    %c0_1 = arith.constant 0 : index
    %c0_2 = arith.constant 0 : index
    %3 = vector.load %arg0[%c0_1, %c0_2] : memref<120x48xbf16, #tpu.memory_space<vmem>>, vector<120x48xbf16>
    %c0_3 = arith.constant 0 : index
    %c0_4 = arith.constant 0 : index
    %4 = vector.load %arg2[%c0_3, %c0_4] : memref<48x64xbf16, #tpu.memory_space<vmem>>, vector<48x64xbf16>
    %cst = arith.constant dense<0.000000e+00> : vector<120x64xf32>
    %5 = tpu.matmul %3, %4, %cst {dimension_numbers = #tpu.dot_dimension_numbers<[1], [0], [0], [1], [0, 0, 1, 1], [], []>} : vector<120x48xbf16>, vector<48x64xbf16>, vector<120x64xf32> -> vector<120x64xf32>
    %6 = arith.truncf %5 : vector<120x64xf32> to vector<120x64xbf16>
    %7 = vector.extract_strided_slice %6 {offsets = [0, 0], sizes = [120, 32], strides = [1, 1]} : vector<120x64xbf16> to vector<120x32xbf16>
    %cst_5 = arith.constant dense<0.000000e+00> : vector<48x32xf32>
    %8 = tpu.matmul %1, %7, %cst_5 {dimension_numbers = #tpu.dot_dimension_numbers<[1], [0], [0], [1], [0, 0, 1, 1], [], []>} : vector<48x120xbf16>, vector<120x32xbf16>, vector<48x32xf32> -> vector<48x32xf32>
    %9 = vector.extract_strided_slice %6 {offsets = [0, 32], sizes = [120, 32], strides = [1, 1]} : vector<120x64xbf16> to vector<120x32xbf16>
    %cst_6 = arith.constant dense<0.000000e+00> : vector<72x32xf32>
    %10 = tpu.matmul %2, %9, %cst_6 {dimension_numbers = #tpu.dot_dimension_numbers<[1], [0], [0], [1], [0, 0, 1, 1], [], []>} : vector<72x120xbf16>, vector<120x32xbf16>, vector<72x32xf32> -> vector<72x32xf32>
    %c0_7 = arith.constant 0 : index
    %c0_8 = arith.constant 0 : index
    %11 = vector.load %arg4[%c0_7, %c0_8] : memref<6x32xf32, #tpu.memory_space<vmem>>, vector<6x32xf32>
    %12 = vector.extract_strided_slice %8 {offsets = [0, 0], sizes = [16, 32], strides = [1, 1]} : vector<48x32xf32> to vector<16x32xf32>
    %13 = vector.extract_strided_slice %11 {offsets = [0, 0], sizes = [1, 32], strides = [1, 1]} : vector<6x32xf32> to vector<1x32xf32>
    %14 = vector.shape_cast %13 : vector<1x32xf32> to vector<32xf32>
    %15 = vector.shape_cast %14 : vector<32xf32> to vector<1x32xf32>
    %16 = vector.broadcast %15 : vector<1x32xf32> to vector<16x32xf32>
    %17 = arith.addf %12, %16 : vector<16x32xf32>
    %cst_9 = arith.constant 0.000000e+00 : f32
    %18 = vector.broadcast %cst_9 : f32 to vector<16x32xf32>
    %19 = arith.maximumf %17, %18 : vector<16x32xf32>
    %20 = vector.extract_strided_slice %10 {offsets = [0, 0], sizes = [24, 32], strides = [1, 1]} : vector<72x32xf32> to vector<24x32xf32>
    %21 = vector.extract_strided_slice %11 {offsets = [3, 0], sizes = [1, 32], strides = [1, 1]} : vector<6x32xf32> to vector<1x32xf32>
    %22 = vector.shape_cast %21 : vector<1x32xf32> to vector<32xf32>
    %23 = vector.shape_cast %22 : vector<32xf32> to vector<1x32xf32>
    %24 = vector.broadcast %23 : vector<1x32xf32> to vector<24x32xf32>
    %25 = arith.addf %20, %24 : vector<24x32xf32>
    %cst_10 = arith.constant 0.000000e+00 : f32
    %26 = vector.broadcast %cst_10 : f32 to vector<24x32xf32>
    %27 = arith.maximumf %25, %26 : vector<24x32xf32>
    %c0_11 = arith.constant 0 : index
    %c0_12 = arith.constant 0 : index
    %28 = vector.load %arg3[%c0_11, %c0_12] : memref<64x64xbf16, #tpu.memory_space<vmem>>, vector<64x64xbf16>
    %29 = arith.truncf %19 : vector<16x32xf32> to vector<16x32xbf16>
    %30 = vector.extract_strided_slice %28 {offsets = [0, 0], sizes = [32, 64], strides = [1, 1]} : vector<64x64xbf16> to vector<32x64xbf16>
    %cst_13 = arith.constant dense<0.000000e+00> : vector<16x64xf32>
    %31 = tpu.matmul %29, %30, %cst_13 {dimension_numbers = #tpu.dot_dimension_numbers<[1], [0], [0], [1], [0, 0, 1, 1], [], []>} : vector<16x32xbf16>, vector<32x64xbf16>, vector<16x64xf32> -> vector<16x64xf32>
    %32 = arith.truncf %27 : vector<24x32xf32> to vector<24x32xbf16>
    %33 = vector.extract_strided_slice %28 {offsets = [32, 0], sizes = [32, 64], strides = [1, 1]} : vector<64x64xbf16> to vector<32x64xbf16>
    %cst_14 = arith.constant dense<0.000000e+00> : vector<24x64xf32>
    %34 = tpu.matmul %32, %33, %cst_14 {dimension_numbers = #tpu.dot_dimension_numbers<[1], [0], [0], [1], [0, 0, 1, 1], [], []>} : vector<24x32xbf16>, vector<32x64xbf16>, vector<24x64xf32> -> vector<24x64xf32>
    %35 = vector.extract_strided_slice %8 {offsets = [16, 0], sizes = [16, 32], strides = [1, 1]} : vector<48x32xf32> to vector<16x32xf32>
    %36 = vector.extract_strided_slice %11 {offsets = [1, 0], sizes = [1, 32], strides = [1, 1]} : vector<6x32xf32> to vector<1x32xf32>
    %37 = vector.shape_cast %36 : vector<1x32xf32> to vector<32xf32>
    %38 = vector.shape_cast %37 : vector<32xf32> to vector<1x32xf32>
    %39 = vector.broadcast %38 : vector<1x32xf32> to vector<16x32xf32>
    %40 = arith.addf %35, %39 : vector<16x32xf32>
    %41 = vector.extract_strided_slice %10 {offsets = [24, 0], sizes = [24, 32], strides = [1, 1]} : vector<72x32xf32> to vector<24x32xf32>
    %42 = vector.extract_strided_slice %11 {offsets = [4, 0], sizes = [1, 32], strides = [1, 1]} : vector<6x32xf32> to vector<1x32xf32>
    %43 = vector.shape_cast %42 : vector<1x32xf32> to vector<32xf32>
    %44 = vector.shape_cast %43 : vector<32xf32> to vector<1x32xf32>
    %45 = vector.broadcast %44 : vector<1x32xf32> to vector<24x32xf32>
    %46 = arith.addf %41, %45 : vector<24x32xf32>
    %47 = vector.extract_strided_slice %31 {offsets = [0, 0], sizes = [16, 32], strides = [1, 1]} : vector<16x64xf32> to vector<16x32xf32>
    %48 = arith.addf %40, %47 : vector<16x32xf32>
    %49 = vector.extract_strided_slice %34 {offsets = [0, 0], sizes = [24, 32], strides = [1, 1]} : vector<24x64xf32> to vector<24x32xf32>
    %50 = arith.addf %46, %49 : vector<24x32xf32>
    %cst_15 = arith.constant 0.000000e+00 : f32
    %51 = vector.broadcast %cst_15 : f32 to vector<16x32xf32>
    %52 = arith.maximumf %48, %51 : vector<16x32xf32>
    %cst_16 = arith.constant 0.000000e+00 : f32
    %53 = vector.broadcast %cst_16 : f32 to vector<24x32xf32>
    %54 = arith.maximumf %50, %53 : vector<24x32xf32>
    %55 = vector.extract_strided_slice %8 {offsets = [32, 0], sizes = [16, 32], strides = [1, 1]} : vector<48x32xf32> to vector<16x32xf32>
    %56 = vector.extract_strided_slice %11 {offsets = [2, 0], sizes = [1, 32], strides = [1, 1]} : vector<6x32xf32> to vector<1x32xf32>
    %57 = vector.shape_cast %56 : vector<1x32xf32> to vector<32xf32>
    %58 = vector.shape_cast %57 : vector<32xf32> to vector<1x32xf32>
    %59 = vector.broadcast %58 : vector<1x32xf32> to vector<16x32xf32>
    %60 = arith.addf %55, %59 : vector<16x32xf32>
    %61 = vector.extract_strided_slice %10 {offsets = [48, 0], sizes = [24, 32], strides = [1, 1]} : vector<72x32xf32> to vector<24x32xf32>
    %62 = vector.extract_strided_slice %11 {offsets = [5, 0], sizes = [1, 32], strides = [1, 1]} : vector<6x32xf32> to vector<1x32xf32>
    %63 = vector.shape_cast %62 : vector<1x32xf32> to vector<32xf32>
    %64 = vector.shape_cast %63 : vector<32xf32> to vector<1x32xf32>
    %65 = vector.broadcast %64 : vector<1x32xf32> to vector<24x32xf32>
    %66 = arith.addf %61, %65 : vector<24x32xf32>
    %67 = vector.extract_strided_slice %31 {offsets = [0, 32], sizes = [16, 32], strides = [1, 1]} : vector<16x64xf32> to vector<16x32xf32>
    %68 = arith.addf %60, %67 : vector<16x32xf32>
    %69 = vector.extract_strided_slice %34 {offsets = [0, 32], sizes = [24, 32], strides = [1, 1]} : vector<24x64xf32> to vector<24x32xf32>
    %70 = arith.addf %66, %69 : vector<24x32xf32>
    %cst_17 = arith.constant 0.000000e+00 : f32
    %71 = vector.broadcast %cst_17 : f32 to vector<16x32xf32>
    %72 = arith.maximumf %68, %71 : vector<16x32xf32>
    %cst_18 = arith.constant 0.000000e+00 : f32
    %73 = vector.broadcast %cst_18 : f32 to vector<24x32xf32>
    %74 = arith.maximumf %70, %73 : vector<24x32xf32>
    %75 = tpu.concatenate %19, %52, %72, %27, %54, %74 in 0 : vector<16x32xf32>, vector<16x32xf32>, vector<16x32xf32>, vector<24x32xf32>, vector<24x32xf32>, vector<24x32xf32> -> vector<120x32xf32>
    %c0_19 = arith.constant 0 : index
    %c0_20 = arith.constant 0 : index
    %76 = vector.load %arg5[%c0_19, %c0_20] : memref<120x32xf32, #tpu.memory_space<vmem>>, vector<120x32xf32>
    %77 = arith.mulf %75, %76 : vector<120x32xf32>
    %78 = arith.truncf %77 : vector<120x32xf32> to vector<120x32xbf16>
    %c0_21 = arith.constant 0 : index
    %c0_22 = arith.constant 0 : index
    %79 = vector.load %arg6[%c0_21, %c0_22] : memref<192x32xbf16, #tpu.memory_space<vmem>>, vector<192x32xbf16>
    %80 = vector.extract_strided_slice %78 {offsets = [0, 0], sizes = [16, 32], strides = [1, 1]} : vector<120x32xbf16> to vector<16x32xbf16>
    %81 = vector.extract_strided_slice %79 {offsets = [0, 0], sizes = [32, 32], strides = [1, 1]} : vector<192x32xbf16> to vector<32x32xbf16>
    %cst_23 = arith.constant dense<0.000000e+00> : vector<16x32xf32>
    %82 = tpu.matmul %80, %81, %cst_23 {dimension_numbers = #tpu.dot_dimension_numbers<[1], [0], [0], [1], [0, 0, 1, 1], [], []>} : vector<16x32xbf16>, vector<32x32xbf16>, vector<16x32xf32> -> vector<16x32xf32>
    %83 = vector.extract_strided_slice %78 {offsets = [16, 0], sizes = [16, 32], strides = [1, 1]} : vector<120x32xbf16> to vector<16x32xbf16>
    %84 = vector.extract_strided_slice %79 {offsets = [32, 0], sizes = [32, 32], strides = [1, 1]} : vector<192x32xbf16> to vector<32x32xbf16>
    %cst_24 = arith.constant dense<0.000000e+00> : vector<16x32xf32>
    %85 = tpu.matmul %83, %84, %cst_24 {dimension_numbers = #tpu.dot_dimension_numbers<[1], [0], [0], [1], [0, 0, 1, 1], [], []>} : vector<16x32xbf16>, vector<32x32xbf16>, vector<16x32xf32> -> vector<16x32xf32>
    %86 = vector.extract_strided_slice %78 {offsets = [32, 0], sizes = [16, 32], strides = [1, 1]} : vector<120x32xbf16> to vector<16x32xbf16>
    %87 = vector.extract_strided_slice %79 {offsets = [64, 0], sizes = [32, 32], strides = [1, 1]} : vector<192x32xbf16> to vector<32x32xbf16>
    %cst_25 = arith.constant dense<0.000000e+00> : vector<16x32xf32>
    %88 = tpu.matmul %86, %87, %cst_25 {dimension_numbers = #tpu.dot_dimension_numbers<[1], [0], [0], [1], [0, 0, 1, 1], [], []>} : vector<16x32xbf16>, vector<32x32xbf16>, vector<16x32xf32> -> vector<16x32xf32>
    %89 = vector.extract_strided_slice %78 {offsets = [48, 0], sizes = [24, 32], strides = [1, 1]} : vector<120x32xbf16> to vector<24x32xbf16>
    %90 = vector.extract_strided_slice %79 {offsets = [96, 0], sizes = [32, 32], strides = [1, 1]} : vector<192x32xbf16> to vector<32x32xbf16>
    %cst_26 = arith.constant dense<0.000000e+00> : vector<24x32xf32>
    %91 = tpu.matmul %89, %90, %cst_26 {dimension_numbers = #tpu.dot_dimension_numbers<[1], [0], [0], [1], [0, 0, 1, 1], [], []>} : vector<24x32xbf16>, vector<32x32xbf16>, vector<24x32xf32> -> vector<24x32xf32>
    %92 = vector.extract_strided_slice %78 {offsets = [72, 0], sizes = [24, 32], strides = [1, 1]} : vector<120x32xbf16> to vector<24x32xbf16>
    %93 = vector.extract_strided_slice %79 {offsets = [128, 0], sizes = [32, 32], strides = [1, 1]} : vector<192x32xbf16> to vector<32x32xbf16>
    %cst_27 = arith.constant dense<0.000000e+00> : vector<24x32xf32>
    %94 = tpu.matmul %92, %93, %cst_27 {dimension_numbers = #tpu.dot_dimension_numbers<[1], [0], [0], [1], [0, 0, 1, 1], [], []>} : vector<24x32xbf16>, vector<32x32xbf16>, vector<24x32xf32> -> vector<24x32xf32>
    %95 = vector.extract_strided_slice %78 {offsets = [96, 0], sizes = [24, 32], strides = [1, 1]} : vector<120x32xbf16> to vector<24x32xbf16>
    %96 = vector.extract_strided_slice %79 {offsets = [160, 0], sizes = [32, 32], strides = [1, 1]} : vector<192x32xbf16> to vector<32x32xbf16>
    %cst_28 = arith.constant dense<0.000000e+00> : vector<24x32xf32>
    %97 = tpu.matmul %95, %96, %cst_28 {dimension_numbers = #tpu.dot_dimension_numbers<[1], [0], [0], [1], [0, 0, 1, 1], [], []>} : vector<24x32xbf16>, vector<32x32xbf16>, vector<24x32xf32> -> vector<24x32xf32>
    %98 = tpu.concatenate %82, %85, %88, %91, %94, %97 in 0 : vector<16x32xf32>, vector<16x32xf32>, vector<16x32xf32>, vector<24x32xf32>, vector<24x32xf32>, vector<24x32xf32> -> vector<120x32xf32>
    %99 = arith.truncf %98 : vector<120x32xf32> to vector<120x32xbf16>
    %100 = vector.extract_strided_slice %99 {offsets = [0, 0], sizes = [120, 16], strides = [1, 1]} : vector<120x32xbf16> to vector<120x16xbf16>
    %cst_29 = arith.constant dense<0.000000e+00> : vector<48x16xf32>
    %101 = tpu.matmul %1, %100, %cst_29 {dimension_numbers = #tpu.dot_dimension_numbers<[1], [0], [0], [1], [0, 0, 1, 1], [], []>} : vector<48x120xbf16>, vector<120x16xbf16>, vector<48x16xf32> -> vector<48x16xf32>
    %102 = vector.extract_strided_slice %99 {offsets = [0, 16], sizes = [120, 16], strides = [1, 1]} : vector<120x32xbf16> to vector<120x16xbf16>
    %cst_30 = arith.constant dense<0.000000e+00> : vector<72x16xf32>
    %103 = tpu.matmul %2, %102, %cst_30 {dimension_numbers = #tpu.dot_dimension_numbers<[1], [0], [0], [1], [0, 0, 1, 1], [], []>} : vector<72x120xbf16>, vector<120x16xbf16>, vector<72x16xf32> -> vector<72x16xf32>
    %c0_31 = arith.constant 0 : index
    %c0_32 = arith.constant 0 : index
    %104 = vector.load %arg8[%c0_31, %c0_32] : memref<6x16xf32, #tpu.memory_space<vmem>>, vector<6x16xf32>
    %105 = vector.extract_strided_slice %101 {offsets = [0, 0], sizes = [16, 16], strides = [1, 1]} : vector<48x16xf32> to vector<16x16xf32>
    %106 = vector.extract_strided_slice %104 {offsets = [0, 0], sizes = [1, 16], strides = [1, 1]} : vector<6x16xf32> to vector<1x16xf32>
    %107 = vector.shape_cast %106 : vector<1x16xf32> to vector<16xf32>
    %108 = vector.shape_cast %107 : vector<16xf32> to vector<1x16xf32>
    %109 = vector.broadcast %108 : vector<1x16xf32> to vector<16x16xf32>
    %110 = arith.addf %105, %109 : vector<16x16xf32>
    %cst_33 = arith.constant 0.000000e+00 : f32
    %111 = vector.broadcast %cst_33 : f32 to vector<16x16xf32>
    %112 = arith.maximumf %110, %111 : vector<16x16xf32>
    %113 = vector.extract_strided_slice %103 {offsets = [0, 0], sizes = [24, 16], strides = [1, 1]} : vector<72x16xf32> to vector<24x16xf32>
    %114 = vector.extract_strided_slice %104 {offsets = [3, 0], sizes = [1, 16], strides = [1, 1]} : vector<6x16xf32> to vector<1x16xf32>
    %115 = vector.shape_cast %114 : vector<1x16xf32> to vector<16xf32>
    %116 = vector.shape_cast %115 : vector<16xf32> to vector<1x16xf32>
    %117 = vector.broadcast %116 : vector<1x16xf32> to vector<24x16xf32>
    %118 = arith.addf %113, %117 : vector<24x16xf32>
    %cst_34 = arith.constant 0.000000e+00 : f32
    %119 = vector.broadcast %cst_34 : f32 to vector<24x16xf32>
    %120 = arith.maximumf %118, %119 : vector<24x16xf32>
    %c0_35 = arith.constant 0 : index
    %c0_36 = arith.constant 0 : index
    %121 = vector.load %arg7[%c0_35, %c0_36] : memref<32x32xbf16, #tpu.memory_space<vmem>>, vector<32x32xbf16>
    %122 = arith.truncf %112 : vector<16x16xf32> to vector<16x16xbf16>
    %123 = vector.extract_strided_slice %121 {offsets = [0, 0], sizes = [16, 32], strides = [1, 1]} : vector<32x32xbf16> to vector<16x32xbf16>
    %cst_37 = arith.constant dense<0.000000e+00> : vector<16x32xf32>
    %124 = tpu.matmul %122, %123, %cst_37 {dimension_numbers = #tpu.dot_dimension_numbers<[1], [0], [0], [1], [0, 0, 1, 1], [], []>} : vector<16x16xbf16>, vector<16x32xbf16>, vector<16x32xf32> -> vector<16x32xf32>
    %125 = arith.truncf %120 : vector<24x16xf32> to vector<24x16xbf16>
    %126 = vector.extract_strided_slice %121 {offsets = [16, 0], sizes = [16, 32], strides = [1, 1]} : vector<32x32xbf16> to vector<16x32xbf16>
    %cst_38 = arith.constant dense<0.000000e+00> : vector<24x32xf32>
    %127 = tpu.matmul %125, %126, %cst_38 {dimension_numbers = #tpu.dot_dimension_numbers<[1], [0], [0], [1], [0, 0, 1, 1], [], []>} : vector<24x16xbf16>, vector<16x32xbf16>, vector<24x32xf32> -> vector<24x32xf32>
    %128 = vector.extract_strided_slice %101 {offsets = [16, 0], sizes = [16, 16], strides = [1, 1]} : vector<48x16xf32> to vector<16x16xf32>
    %129 = vector.extract_strided_slice %104 {offsets = [1, 0], sizes = [1, 16], strides = [1, 1]} : vector<6x16xf32> to vector<1x16xf32>
    %130 = vector.shape_cast %129 : vector<1x16xf32> to vector<16xf32>
    %131 = vector.shape_cast %130 : vector<16xf32> to vector<1x16xf32>
    %132 = vector.broadcast %131 : vector<1x16xf32> to vector<16x16xf32>
    %133 = arith.addf %128, %132 : vector<16x16xf32>
    %134 = vector.extract_strided_slice %103 {offsets = [24, 0], sizes = [24, 16], strides = [1, 1]} : vector<72x16xf32> to vector<24x16xf32>
    %135 = vector.extract_strided_slice %104 {offsets = [4, 0], sizes = [1, 16], strides = [1, 1]} : vector<6x16xf32> to vector<1x16xf32>
    %136 = vector.shape_cast %135 : vector<1x16xf32> to vector<16xf32>
    %137 = vector.shape_cast %136 : vector<16xf32> to vector<1x16xf32>
    %138 = vector.broadcast %137 : vector<1x16xf32> to vector<24x16xf32>
    %139 = arith.addf %134, %138 : vector<24x16xf32>
    %140 = vector.extract_strided_slice %124 {offsets = [0, 0], sizes = [16, 16], strides = [1, 1]} : vector<16x32xf32> to vector<16x16xf32>
    %141 = arith.addf %133, %140 : vector<16x16xf32>
    %142 = vector.extract_strided_slice %127 {offsets = [0, 0], sizes = [24, 16], strides = [1, 1]} : vector<24x32xf32> to vector<24x16xf32>
    %143 = arith.addf %139, %142 : vector<24x16xf32>
    %cst_39 = arith.constant 0.000000e+00 : f32
    %144 = vector.broadcast %cst_39 : f32 to vector<16x16xf32>
    %145 = arith.maximumf %141, %144 : vector<16x16xf32>
    %cst_40 = arith.constant 0.000000e+00 : f32
    %146 = vector.broadcast %cst_40 : f32 to vector<24x16xf32>
    %147 = arith.maximumf %143, %146 : vector<24x16xf32>
    %148 = vector.extract_strided_slice %101 {offsets = [32, 0], sizes = [16, 16], strides = [1, 1]} : vector<48x16xf32> to vector<16x16xf32>
    %149 = vector.extract_strided_slice %104 {offsets = [2, 0], sizes = [1, 16], strides = [1, 1]} : vector<6x16xf32> to vector<1x16xf32>
    %150 = vector.shape_cast %149 : vector<1x16xf32> to vector<16xf32>
    %151 = vector.shape_cast %150 : vector<16xf32> to vector<1x16xf32>
    %152 = vector.broadcast %151 : vector<1x16xf32> to vector<16x16xf32>
    %153 = arith.addf %148, %152 : vector<16x16xf32>
    %154 = vector.extract_strided_slice %103 {offsets = [48, 0], sizes = [24, 16], strides = [1, 1]} : vector<72x16xf32> to vector<24x16xf32>
    %155 = vector.extract_strided_slice %104 {offsets = [5, 0], sizes = [1, 16], strides = [1, 1]} : vector<6x16xf32> to vector<1x16xf32>
    %156 = vector.shape_cast %155 : vector<1x16xf32> to vector<16xf32>
    %157 = vector.shape_cast %156 : vector<16xf32> to vector<1x16xf32>
    %158 = vector.broadcast %157 : vector<1x16xf32> to vector<24x16xf32>
    %159 = arith.addf %154, %158 : vector<24x16xf32>
    %160 = vector.extract_strided_slice %124 {offsets = [0, 16], sizes = [16, 16], strides = [1, 1]} : vector<16x32xf32> to vector<16x16xf32>
    %161 = arith.addf %153, %160 : vector<16x16xf32>
    %162 = vector.extract_strided_slice %127 {offsets = [0, 16], sizes = [24, 16], strides = [1, 1]} : vector<24x32xf32> to vector<24x16xf32>
    %163 = arith.addf %159, %162 : vector<24x16xf32>
    %cst_41 = arith.constant 0.000000e+00 : f32
    %164 = vector.broadcast %cst_41 : f32 to vector<16x16xf32>
    %165 = arith.maximumf %161, %164 : vector<16x16xf32>
    %cst_42 = arith.constant 0.000000e+00 : f32
    %166 = vector.broadcast %cst_42 : f32 to vector<24x16xf32>
    %167 = arith.maximumf %163, %166 : vector<24x16xf32>
    %168 = tpu.concatenate %112, %145, %165, %120, %147, %167 in 0 : vector<16x16xf32>, vector<16x16xf32>, vector<16x16xf32>, vector<24x16xf32>, vector<24x16xf32>, vector<24x16xf32> -> vector<120x16xf32>
    %169 = arith.truncf %168 : vector<120x16xf32> to vector<120x16xbf16>
    %c0_43 = arith.constant 0 : index
    %c0_44 = arith.constant 0 : index
    %170 = vector.load %arg9[%c0_43, %c0_44] : memref<96x128xbf16, #tpu.memory_space<vmem>>, vector<96x128xbf16>
    %c0_45 = arith.constant 0 : index
    %c0_46 = arith.constant 0 : index
    %171 = vector.load %arg10[%c0_45, %c0_46] : memref<2x128xf32, #tpu.memory_space<vmem>>, vector<2x128xf32>
    %172 = vector.extract_strided_slice %171 {offsets = [0, 0], sizes = [1, 128], strides = [1, 1]} : vector<2x128xf32> to vector<1x128xf32>
    %173 = vector.shape_cast %172 : vector<1x128xf32> to vector<128xf32>
    %174 = vector.shape_cast %173 : vector<128xf32> to vector<1x128xf32>
    %175 = vector.extract_strided_slice %171 {offsets = [1, 0], sizes = [1, 128], strides = [1, 1]} : vector<2x128xf32> to vector<1x128xf32>
    %176 = vector.shape_cast %175 : vector<1x128xf32> to vector<128xf32>
    %177 = vector.shape_cast %176 : vector<128xf32> to vector<1x128xf32>
    %178 = vector.extract_strided_slice %169 {offsets = [0, 0], sizes = [16, 16], strides = [1, 1]} : vector<120x16xbf16> to vector<16x16xbf16>
    %179 = vector.extract_strided_slice %170 {offsets = [0, 0], sizes = [16, 128], strides = [1, 1]} : vector<96x128xbf16> to vector<16x128xbf16>
    %cst_47 = arith.constant dense<0.000000e+00> : vector<16x128xf32>
    %180 = tpu.matmul %178, %179, %cst_47 {dimension_numbers = #tpu.dot_dimension_numbers<[1], [0], [0], [1], [0, 0, 1, 1], [], []>} : vector<16x16xbf16>, vector<16x128xbf16>, vector<16x128xf32> -> vector<16x128xf32>
    %181 = vector.broadcast %174 : vector<1x128xf32> to vector<16x128xf32>
    %182 = arith.addf %181, %180 : vector<16x128xf32>
    %183 = vector.extract_strided_slice %169 {offsets = [48, 0], sizes = [24, 16], strides = [1, 1]} : vector<120x16xbf16> to vector<24x16xbf16>
    %184 = vector.extract_strided_slice %170 {offsets = [48, 0], sizes = [16, 128], strides = [1, 1]} : vector<96x128xbf16> to vector<16x128xbf16>
    %cst_48 = arith.constant dense<0.000000e+00> : vector<24x128xf32>
    %185 = tpu.matmul %183, %184, %cst_48 {dimension_numbers = #tpu.dot_dimension_numbers<[1], [0], [0], [1], [0, 0, 1, 1], [], []>} : vector<24x16xbf16>, vector<16x128xbf16>, vector<24x128xf32> -> vector<24x128xf32>
    %186 = vector.broadcast %177 : vector<1x128xf32> to vector<24x128xf32>
    %187 = arith.addf %186, %185 : vector<24x128xf32>
    %188 = vector.extract_strided_slice %169 {offsets = [16, 0], sizes = [16, 16], strides = [1, 1]} : vector<120x16xbf16> to vector<16x16xbf16>
    %189 = vector.extract_strided_slice %170 {offsets = [16, 0], sizes = [16, 128], strides = [1, 1]} : vector<96x128xbf16> to vector<16x128xbf16>
    %cst_49 = arith.constant dense<0.000000e+00> : vector<16x128xf32>
    %190 = tpu.matmul %188, %189, %cst_49 {dimension_numbers = #tpu.dot_dimension_numbers<[1], [0], [0], [1], [0, 0, 1, 1], [], []>} : vector<16x16xbf16>, vector<16x128xbf16>, vector<16x128xf32> -> vector<16x128xf32>
    %191 = arith.addf %182, %190 : vector<16x128xf32>
    %192 = vector.extract_strided_slice %169 {offsets = [72, 0], sizes = [24, 16], strides = [1, 1]} : vector<120x16xbf16> to vector<24x16xbf16>
    %193 = vector.extract_strided_slice %170 {offsets = [64, 0], sizes = [16, 128], strides = [1, 1]} : vector<96x128xbf16> to vector<16x128xbf16>
    %cst_50 = arith.constant dense<0.000000e+00> : vector<24x128xf32>
    %194 = tpu.matmul %192, %193, %cst_50 {dimension_numbers = #tpu.dot_dimension_numbers<[1], [0], [0], [1], [0, 0, 1, 1], [], []>} : vector<24x16xbf16>, vector<16x128xbf16>, vector<24x128xf32> -> vector<24x128xf32>
    %195 = arith.addf %187, %194 : vector<24x128xf32>
    %196 = vector.extract_strided_slice %169 {offsets = [32, 0], sizes = [16, 16], strides = [1, 1]} : vector<120x16xbf16> to vector<16x16xbf16>
    %197 = vector.extract_strided_slice %170 {offsets = [32, 0], sizes = [16, 128], strides = [1, 1]} : vector<96x128xbf16> to vector<16x128xbf16>
    %cst_51 = arith.constant dense<0.000000e+00> : vector<16x128xf32>
    %198 = tpu.matmul %196, %197, %cst_51 {dimension_numbers = #tpu.dot_dimension_numbers<[1], [0], [0], [1], [0, 0, 1, 1], [], []>} : vector<16x16xbf16>, vector<16x128xbf16>, vector<16x128xf32> -> vector<16x128xf32>
    %199 = arith.addf %191, %198 : vector<16x128xf32>
    %200 = vector.extract_strided_slice %169 {offsets = [96, 0], sizes = [24, 16], strides = [1, 1]} : vector<120x16xbf16> to vector<24x16xbf16>
    %201 = vector.extract_strided_slice %170 {offsets = [80, 0], sizes = [16, 128], strides = [1, 1]} : vector<96x128xbf16> to vector<16x128xbf16>
    %cst_52 = arith.constant dense<0.000000e+00> : vector<24x128xf32>
    %202 = tpu.matmul %200, %201, %cst_52 {dimension_numbers = #tpu.dot_dimension_numbers<[1], [0], [0], [1], [0, 0, 1, 1], [], []>} : vector<24x16xbf16>, vector<16x128xbf16>, vector<24x128xf32> -> vector<24x128xf32>
    %203 = arith.addf %195, %202 : vector<24x128xf32>
    %204 = tpu.concatenate %199, %203 in 0 : vector<16x128xf32>, vector<24x128xf32> -> vector<40x128xf32>
    %c0_53 = arith.constant 0 : index
    %c0_54 = arith.constant 0 : index
    %205 = vector.load %arg11[%c0_53, %c0_54] : memref<40x128xf32, #tpu.memory_space<vmem>>, vector<40x128xf32>
    tpu.vector_store %arg11[%c0_53, %c0_54], %204 {strides = array<i32>} : memref<40x128xf32, #tpu.memory_space<vmem>>, vector<40x128xf32>,
    return
  }
}

</mosaic_0001>

<bundles_post_ra>
// kernel: dual_hgcn_forward.1
= control target key start
LH: loop header
LB: loop body
LE: loop exit
PB: predicated region body
PF: predicated region fallthrough
CT: control target
= control target key end

     0   :  { %vm131_vm0 = vcmask 392192   ;;  %v2428_v11 = vmov 0.0   ;;  %vm2429_vm1 = vmmov 0   ;;  %vm285_vm2 = vcmask 1043456   ;;  %s2986_s2 = inlined_call_operand.vmem [shape: bf16[48,64], index: 2, kind: input, shape index: {}]   ;;  %s2987_s0 = inlined_call_operand.vmem [shape: bf16[120,48], index: 0, kind: input, shape index: {}]   ;;  %s2988_s1 = inlined_call_operand.vmem [shape: bf16[120,120], index: 1, kind: input, shape index: {}]   ;;  %s2989_s3 = inlined_call_operand.vmem [shape: bf16[64,64], index: 3, kind: input, shape index: {}]   ;;  %s2990_s4 = inlined_call_operand.vmem [shape: f32[6,32], index: 4, kind: input, shape index: {}]   ;;  %s2991_s5 = inlined_call_operand.vmem [shape: f32[120,32], index: 5, kind: input, shape index: {}]   ;;  %s2992_s6 = inlined_call_operand.vmem [shape: bf16[192,32], index: 6, kind: input, shape index: {}]   ;;  %s2993_s7 = inlined_call_operand.vmem [shape: bf16[32,32], index: 7, kind: input, shape index: {}]   ;;  %s2994_s8 = inlined_call_operand.vmem [shape: f32[6,16], index: 8, kind: input, shape index: {}]   ;;  %s2995_s9 = inlined_call_operand.vmem [shape: bf16[96,128], index: 9, kind: input, shape index: {}]   ;;  %s2996_s10 = inlined_call_operand.vmem [shape: f32[2,128], index: 10, kind: input, shape index: {}]   ;;  %s2997_s11 = inlined_call_operand.vmem [shape: f32[40,128], index: 11, kind: output, shape index: {}]  }
   0x1   :  { %v2385_v0 = vld [vmem:[%s2986_s2] sm:$0xff]   ;;  %v2386_v1 = vld [vmem:[%s2986_s2 + $0x8] sm:$0xff]   ;;  %v2387_v3 = vld [vmem:[%s2986_s2 + $0x10] sm:$0xff]   ;;  %2120 = vmatprep.subr.bf16.mxu1 %v2428_v11  ;;  %2136 = vmatprep.mubr.msk.bf16.mxu1 %vm2429_vm1, %v2428_v11  ;;  %vm275_vm3 = vcmask 982016   ;;  %v491_v53 = vlaneseq  ;;  %vm530_vm4 = vcmask 261120   ;;  %vm1347_vm5 = vcmask 130048  }
   0x2   :  { %2098 = vmatprep.subr.bf16.mxu0 %v2385_v0  ;;  %v2388_v2 = vld [vmem:[%s2987_s0] sm:$0xff]   ;;  %v2389_v4 = vld [vmem:[%s2987_s0 + $0x8] sm:$0xff]   ;;  %v2390_v5 = vld [vmem:[%s2987_s0 + $0x10] sm:$0xff]  }
   0x3   :  { %2099 = vmatpush3.bf16.msra.mxu0 %v2385_v0  ;;  %2104 = vmatprep.mubr.msk.bf16.mxu0 %vm131_vm0, %v2388_v2  ;;  %v2391_v6 = vld [vmem:[%s2987_s0 + $0x18] sm:$0xff]   ;;  %v2392_v7 = vld [vmem:[%s2987_s0 + $0x20] sm:$0xff]   ;;  %v2393_v8 = vld [vmem:[%s2987_s0 + $0x28] sm:$0xff]   ;;  %v2617_v54 = vshrl.u32 %v491_v53, 7 }
   0x4   :  { %2100 = vmatprep.subr.bf16.mxu0 %v2386_v1  ;;  %v2394_v9 = vld [vmem:[%s2987_s0 + $0x30] sm:$0xff]   ;;  %v2395_v10 = vld [vmem:[%s2987_s0 + $0x38] ss:$0 sps:$4 sm:$0xff]   ;;  %s2430_s0 = smov 96   ;;  %v2558_v37 = vld [vmem:[%s2988_s1] sm:$0xff]  }
   0x5   :  { %v2568_v38 = vld [vmem:[%s2988_s1 + $0x8] sm:$0xff]   ;;  %v2577_v40 = vld [vmem:[%s2988_s1 + $0x10] sm:$0xff]   ;;  %v2401_v41 = vld [vmem:[%s2989_s3] sm:$0xff]   ;;  %v2623_v56 = vsub.s32 0, %v2617_v54 }
   0x6   :  { %v2402_v43 = vld [vmem:[%s2989_s3 + $0x8] sm:$0xff]   ;;  %v2601_v51 = vld [vmem:[%s2988_s1 + $0x18] sm:$0xff]   ;;  %v2611_v52 = vld [vmem:[%s2988_s1 + $0x20] sm:$0xff]  }
   0x7   :  { %2101 = vmatpush3.bf16.msra.mxu0 %v2386_v1  ;;  %v2403_v55 = vld [vmem:[%s2989_s3 + $0x10] sm:$0xff]   ;;  %v2628_v57 = vld [vmem:[%s2990_s4] sm:$0x3f]  ;;  %v2633_v58 = vld [vmem:[%s2988_s1 + $0x28] sm:$0xff]  }
   0x8   :  { %2102 = vmatprep.subr.bf16.mxu0 %v2387_v3  ;;  %v494_v59 = vrot.slane %v2628_v57, %v2623_v56  ;;  %v709_v63 = vld [vmem:[%s2991_s5] sm:$0xff]  ;;  %v2409_v53 = vld [vmem:[%s2992_s6 + $0x18] sm:$0xff]  }
   0xb   :  { %2103 = vmatpush3.bf16.msra.mxu0 %v2387_v3  ;;  %v710_v3 = vld [vmem:[%s2991_s5 + $0x8] sm:$0xff] }
   0xc   :  { %2148 = vmatprep.subr.bf16.mxu0 %v2428_v11 }
   0xe   :  { %2105 = vmatmul.mubr.msk.bf16.vlgmr.msra.gmra.mrb[0].mxu0 %vm131_vm0, %v2389_v4 }
   0xf   :  { %2108 = vmatprep.mubr.msk.bf16.mxu0 %vm131_vm0, %v2390_v5 }
  0x16   :  { %2109 = vmatmul.mubr.msk.bf16.gmra.mrb[4].mxu0 %vm131_vm0, %v2391_v6 }
  0x17   :  { %2112 = vmatprep.mubr.msk.bf16.mxu0 %vm131_vm0, %v2392_v7  ;;  %v2404_v7 = vld [vmem:[%s2989_s3 + $0x18] sm:$0xff]  }
  0x1e   :  { %2113 = vmatmul.mubr.msk.bf16.gmra.mrb[8].mxu0 %vm131_vm0, %v2393_v8 }
  0x1f   :  { %2116 = vmatprep.mubr.msk.bf16.mxu0 %vm131_vm0, %v2394_v9 }
  0x26   :  { %2117 = vmatmul.mubr.msk.bf16.gmra.mrb[12].mxu0 %vm131_vm0, %v2395_v10 }
  0x27   :  { %2164 = vmatprep.mubr.msk.bf16.mxu0 %vm2429_vm1, %v2428_v11 }
  0xe1   :  { %v2106_v12 = vpop.f32.mrb[0].mxu0 }
  0xe2   :  { %v190_v13 = vpop.f32.mrb[1].mxu0 }
  0xe3   :  { %v2107_v14 = vpop.f32.mrb[2].mxu0 }
  0xe4   :  { %v253_v15 = vpack.c.bf16 %v2107_v14, %v2106_v12  ;;  %v193_v16 = vpop.f32.mrb[3].mxu0 }
  0xe5   :  { %v252_v17 = vpack.c.bf16 %v193_v16, %v190_v13 }
  0xe7   :  { %377 = vrot.lane.b32.xlu0 %v252_v17, %s2430_s0  ;;  %2121 = vmatpush3.bf16.msra.mxu1 %v252_v17 }
  0xe8   :  { %2122 = vmatprep.subr.bf16.mxu1 %v2428_v11 }
  0xe9   :  { %v2110_v18 = vpop.f32.mrb[4].mxu0 }
  0xea   :  { %v206_v19 = vpop.f32.mrb[5].mxu0 }
  0xeb   :  { %379 = vrot.lane.b32.xlu0 %v253_v15, %s2430_s0  ;;  %v2111_v20 = vpop.f32.mrb[6].mxu0  ;;  %2123 = vmatpush3.bf16.msra.mxu1 %v253_v15 }
  0xec   :  { %v255_v21 = vpack.c.bf16 %v2111_v20, %v2110_v18  ;;  %v209_v22 = vpop.f32.mrb[7].mxu0  ;;  %2124 = vmatprep.subr.bf16.mxu1 %v2428_v11  ;;  %v2663_v20 = vld [vmem:[%s2988_s1 + $0x30] sm:$0xff]  }
  0xed   :  { %v254_v23 = vpack.c.bf16 %v209_v22, %v206_v19  ;;  %v2673_v22 = vld [vmem:[%s2988_s1 + $0x38] ss:$0 sps:$4 sm:$0xff]  }
  0xef   :  { %381 = vrot.lane.b32.xlu1 %v254_v23, %s2430_s0  ;;  %2125 = vmatpush3.bf16.msra.mxu1 %v254_v23 }
  0xf0   :  { %2126 = vmatprep.subr.bf16.mxu1 %v2428_v11 }
  0xf1   :  { %v2114_v24 = vpop.f32.mrb[8].mxu0 }
  0xf2   :  { %v222_v25 = vpop.f32.mrb[9].mxu0 }
  0xf3   :  { %383 = vrot.lane.b32.xlu1 %v255_v21, %s2430_s0  ;;  %v2115_v26 = vpop.f32.mrb[10].mxu0  ;;  %2127 = vmatpush3.bf16.msra.mxu1 %v255_v21  ;;  %v501_v21 = vsub.s32 3, %v2617_v54 }
  0xf4   :  { %v257_v27 = vpack.c.bf16 %v2115_v26, %v2114_v24  ;;  %v225_v28 = vpop.f32.mrb[11].mxu0  ;;  %2128 = vmatprep.subr.bf16.mxu1 %v2428_v11 }
  0xf5   :  { %v256_v29 = vpack.c.bf16 %v225_v28, %v222_v25  ;;  %v502_v23 = vrot.slane %v2628_v57, %v501_v21 }
  0xf7   :  { %387 = vrot.lane.b32.xlu1 %v257_v27, %s2430_s0  ;;  %385 = vrot.lane.b32.xlu0 %v256_v29, %s2430_s0 }
  0xf8   :  { %2129 = vmatpush3.bf16.msra.mxu1 %v256_v29 }
  0xf9   :  { %v2118_v30 = vpop.f32.mrb[12].mxu0  ;;  %2130 = vmatprep.subr.bf16.mxu1 %v2428_v11 }
  0xfa   :  { %v259_v31 = vpack.c.bf16 %v2118_v30, %v2118_v30  ;;  %v238_v32 = vpop.f32.mrb[13].mxu0 }
  0xfb   :  { %v2119_v33 = vpop.f32.mrb[14].mxu0 }
  0xfc   :  { %2131 = vmatpush3.bf16.msra.mxu1 %v257_v27  ;;  %391 = vrot.lane.b32.xlu1 %v259_v31, %s2430_s0  ;;  %v241_v34 = vpop.f32.mrb[15].mxu0  ;;  %v287_v36 = vsel %vm285_vm2, %v259_v31, 0  ;;  %v715_v31 = vld [vmem:[%s2991_s5 + $0x30] sm:$0xff] }
  0xfd   :  { %v258_v35 = vpack.c.bf16 %v241_v34, %v238_v32  ;;  %2132 = vmatprep.subr.bf16.mxu1 %v2428_v11  ;;  %v716_v32 = vld [vmem:[%s2991_s5 + $0x38] sm:$0xff] }
  0xff   :  { %389 = vrot.lane.b32.xlu0 %v258_v35, %s2430_s0 }
 0x100   :  { %2133 = vmatpush3.bf16.msra.mxu1 %v258_v35 }
 0x101   :  { %2134 = vmatprep.subr.bf16.mxu1 %v2428_v11 }
 0x104   :  { %2135 = vmatpush3.bf16.msra.mxu1 %v287_v36 }
 0x105   :  { %2184 = vmatprep.subr.bf16.mxu1 %v2428_v11 }
 0x107   :  { %2137 = vmatmul.mubr.msk.bf16.vlgmr.msra.gmra.mrb[0].mxu1 %vm275_vm3, %v2558_v37 }
 0x108   :  { %2140 = vmatprep.mubr.msk.bf16.mxu1 %vm2429_vm1, %v2428_v11  ;;  %2185 = vmatpush3.bf16.msra.mxu1 %v2401_v41 }
 0x109   :  { %2186 = vmatprep.subr.bf16.mxu1 %v2428_v11 }
 0x10c   :  { %2187 = vmatpush3.bf16.msra.mxu1 %v2402_v43 }
 0x10d   :  { %2192 = vmatprep.subr.bf16.mxu1 %v2403_v55 }
 0x10f   :  { %2141 = vmatmul.mubr.msk.bf16.gmra.mrb[4].mxu1 %vm275_vm3, %v2568_v38 }
 0x110   :  { %2144 = vmatprep.mubr.msk.bf16.mxu1 %vm2429_vm1, %v2428_v11 }
 0x117   :  { %2145 = vmatmul.mubr.msk.bf16.gmra.mrb[8].mxu1 %vm275_vm3, %v2577_v40 }
 0x118   :  { %2188 = vmatprep.mubr.msk.bf16.mxu1 %vm2429_vm1, %v2428_v11 }
 0x159   :  { %v378_v39 = vpop.permute.xlu0 %377 }
 0x15a   :  { %2149 = vmatpush3.bf16.msra.mxu0 %v378_v39 }
 0x15b   :  { %2150 = vmatprep.subr.bf16.mxu0 %v2428_v11 }
 0x15d   :  { %v380_v42 = vpop.permute.xlu0 %379 }
 0x15e   :  { %2151 = vmatpush3.bf16.msra.mxu0 %v380_v42 }
 0x15f   :  { %2152 = vmatprep.subr.bf16.mxu0 %v2428_v11 }
 0x161   :  { %v382_v44 = vpop.permute.xlu1 %381 }
 0x162   :  { %2153 = vmatpush3.bf16.msra.mxu0 %v382_v44 }
 0x163   :  { %2154 = vmatprep.subr.bf16.mxu0 %v2428_v11 }
 0x165   :  { %v384_v45 = vpop.permute.xlu1 %383 }
 0x166   :  { %2155 = vmatpush3.bf16.msra.mxu0 %v384_v45 }
 0x167   :  { %2156 = vmatprep.subr.bf16.mxu0 %v2428_v11 }
 0x169   :  { %v386_v46 = vpop.permute.xlu0 %385  ;;  %v388_v47 = vpop.permute.xlu1 %387 }
 0x16a   :  { %2157 = vmatpush3.bf16.msra.mxu0 %v386_v46 }
 0x16b   :  { %2158 = vmatprep.subr.bf16.mxu0 %v2428_v11 }
 0x16e   :  { %2159 = vmatpush3.bf16.msra.mxu0 %v388_v47  ;;  %v392_v49 = vpop.permute.xlu1 %391  ;;  %v2406_v47 = vld [vmem:[%s2992_s6] sm:$0xff]  }
 0x16f   :  { %2160 = vmatprep.subr.bf16.mxu0 %v2428_v11  ;;  %v416_v50 = vsel %vm285_vm2, %v392_v49, 0  ;;  %v2407_v49 = vld [vmem:[%s2992_s6 + $0x8] sm:$0xff]  }
 0x171   :  { %v390_v48 = vpop.permute.xlu0 %389 }
 0x172   :  { %2161 = vmatpush3.bf16.msra.mxu0 %v390_v48 }
 0x173   :  { %2162 = vmatprep.subr.bf16.mxu0 %v2428_v11 }
 0x176   :  { %2163 = vmatpush3.bf16.msra.mxu0 %v416_v50  ;;  %v2408_v50 = vld [vmem:[%s2992_s6 + $0x10] sm:$0xff]  }
 0x177   :  { %2216 = vmatprep.subr.bf16.mxu0 %v2428_v11 }
 0x179   :  { %2165 = vmatmul.mubr.msk.bf16.vlgmr.msra.gmra.mrb[16].mxu0 %vm275_vm3, %v2601_v51 }
 0x17a   :  { %2168 = vmatprep.mubr.msk.bf16.mxu0 %vm2429_vm1, %v2428_v11 }
 0x181   :  { %2169 = vmatmul.mubr.msk.bf16.gmra.mrb[20].mxu0 %vm275_vm3, %v2611_v52 }
 0x182   :  { %2172 = vmatprep.mubr.msk.bf16.mxu0 %vm2429_vm1, %v2428_v11 }
 0x189   :  { %2173 = vmatmul.mubr.msk.bf16.gmra.mrb[24].mxu0 %vm275_vm3, %v2633_v58 }
 0x18a   :  { %2176 = vmatprep.mubr.msk.bf16.mxu0 %vm2429_vm1, %v2428_v11 }
 0x191   :  { %2177 = vmatmul.mubr.msk.bf16.gmra.mrb[28].mxu0 %vm275_vm3, %v2663_v20 }
 0x192   :  { %2180 = vmatprep.mubr.msk.bf16.mxu0 %vm2429_vm1, %v2428_v11 }
 0x199   :  { %2181 = vmatmul.mubr.msk.bf16.gmra.mrb[32].mxu0 %vm275_vm3, %v2673_v22 }
 0x19a   :  { %2220 = vmatprep.mubr.msk.bf16.mxu0 %vm2429_vm1, %v2428_v11 }
 0x1da   :  { %v323_v60 = vpop.f32.mrb[0].mxu1 }
 0x1db   :  { %v495_v61 = vadd.f32 %v494_v59, %v323_v60  ;;  %v2138_v62 = vpop.f32.mrb[1].mxu1  ;;  %v2412_v60 = vld [vmem:[%s2992_s6 + $0x20] sm:$0xff]  }
 0x1dc   :  { %v326_v0 = vpop.f32.mrb[2].mxu1  ;;  %2217 = vmatpush3.bf16.msra.mxu0 %v2412_v60  ;;  %v713_v60 = vld [vmem:[%s2991_s5 + $0x20] sm:$0xff] }
 0x1dd   :  { %v497_v1 = vmax.f32 %v495_v61, 0.0  ;;  %v496_v2 = vadd.f32 %v494_v59, %v326_v0  ;;  %v2139_v4 = vpop.f32.mrb[3].mxu1  ;;  %2218 = vmatprep.subr.bf16.mxu0 %v2428_v11 }
 0x1de   :  { %v2737_v4 = vld [vmem:[%s2992_s6 + $0x40] sm:$0xff]  }
 0x1df   :  { %v724_v5 = vmul.f32 %v709_v63, %v497_v1  ;;  %v498_v6 = vmax.f32 %v496_v2, 0.0  ;;  %v2414_v2 = vld [vmem:[%s2992_s6 + $0x30] sm:$0xff]  }
 0x1e1   :  { %v517_v8 = vpack.c.bf16 %v498_v6, %v497_v1  ;;  %v725_v9 = vmul.f32 %v710_v3, %v498_v6  ;;  %v2413_v1 = vld [vmem:[%s2992_s6 + $0x28] sm:$0xff]  }
 0x1e2   :  { %v2651_v12 = vpop.f32.mrb[4].mxu1  ;;  %2219 = vmatpush3.bf16.msra.mxu0 %v2413_v1 }
 0x1e3   :  { %v739_v10 = vpack.c.bf16 %v725_v9, %v724_v5  ;;  %2189 = vmatmul.mubr.msk.bf16.vlgmr.msra.gmra.mrb[12].mxu1 %vm530_vm4, %v517_v8  ;;  %v2142_v13 = vpop.f32.mrb[5].mxu1  ;;  %2232 = vmatprep.subr.bf16.mxu0 %v2737_v4  ;;  %v711_v9 = vld [vmem:[%s2991_s5 + $0x10] sm:$0xff] }
 0x1e4   :  { %2193 = vmatpush3.bf16.msra.mxu1 %v2403_v55  ;;  %v2653_v14 = vpop.f32.mrb[6].mxu1  ;;  %v2717_v55 = vsub.s32 1, %v2617_v54 }
 0x1e5   :  { %2194 = vmatprep.subr.bf16.mxu1 %v2404_v7  ;;  %v2143_v15 = vpop.f32.mrb[7].mxu1 }
 0x1e6   :  { %v646_v0 = vrot.slane %v2628_v57, %v2717_v55 }
 0x1e8   :  { %2195 = vmatpush3.bf16.msra.mxu1 %v2404_v7  ;;  %v647_v3 = vadd.f32 %v646_v0, %v2651_v12  ;;  %v648_v5 = vadd.f32 %v646_v0, %v2653_v14  ;;  %v712_v14 = vld [vmem:[%s2991_s5 + $0x18] sm:$0xff] }
 0x1e9   :  { %2200 = vmatprep.subr.bf16.mxu1 %v2428_v11 }
 0x1ea   :  { %v2656_v16 = vpop.f32.mrb[8].mxu1 }
 0x1eb   :  { %v2146_v17 = vpop.f32.mrb[9].mxu1 }
 0x1ec   :  { %v2658_v18 = vpop.f32.mrb[10].mxu1 }
 0x1ed   :  { %v2147_v19 = vpop.f32.mrb[11].mxu1 }
 0x24c   :  { %v452_v24 = vpop.f32.mrb[16].mxu0 }
 0x24d   :  { %v503_v25 = vadd.f32 %v502_v23, %v452_v24  ;;  %v2166_v26 = vpop.f32.mrb[17].mxu0 }
 0x24e   :  { %v455_v27 = vpop.f32.mrb[18].mxu0 }
 0x24f   :  { %v506_v28 = vmax.f32 %v503_v25, 0.0  ;;  %v504_v29 = vadd.f32 %v502_v23, %v455_v27  ;;  %v2167_v30 = vpop.f32.mrb[19].mxu0  ;;  %v2415_v25 = vld [vmem:[%s2992_s6 + $0x38] sm:$0xff]  }
 0x251   :  { %v507_v33 = vmax.f32 %v504_v29, 0.0  ;;  %v730_v34 = vmul.f32 %v715_v31, %v506_v28  ;;  %v668_v31 = vsub.s32 2, %v2617_v54 }
 0x253   :  { %v575_v35 = vpack.c.bf16 %v507_v33, %v506_v28  ;;  %v731_v36 = vmul.f32 %v716_v32, %v507_v33 }
 0x254   :  { %v460_v39 = vpop.f32.mrb[20].mxu0 }
 0x255   :  { %v742_v41 = vpack.c.bf16 %v731_v36, %v730_v34  ;;  %v505_v42 = vadd.f32 %v502_v23, %v460_v39  ;;  %v2170_v43 = vpop.f32.mrb[21].mxu0  ;;  %2196 = vmatprep.mubr.msk.bf16.mxu1 %vm530_vm4, %v575_v35  ;;  %v669_v35 = vrot.slane %v2628_v57, %v668_v31  ;;  %v651_v36 = vsub.s32 4, %v2617_v54  ;;  %v2418_v39 = vld [vmem:[%s2992_s6 + $0x50] sm:$0xff]  }
 0x256   :  { %v2689_v44 = vpop.f32.mrb[22].mxu0 }
 0x257   :  { %v2691_v45 = vmax.f32 %v505_v42, 0.0  ;;  %v2171_v46 = vpop.f32.mrb[23].mxu0  ;;  %v652_v42 = vrot.slane %v2628_v57, %v651_v36 }
 0x258   :  { %v671_v46 = vadd.f32 %v669_v35, %v2658_v18 }
 0x259   :  { %v576_v48 = vpack.c.bf16 %v2691_v45, %v2691_v45 }
 0x25b   :  { %2197 = vmatmul.mubr.msk.bf16.vlgmr.msra.gmra.mrb[16].mxu1 %vm530_vm4, %v576_v48 }
 0x25c   :  { %2201 = vmatpush3.bf16.msra.mxu1 %v2406_v47  ;;  %2204 = vmatprep.mubr.msk.bf16.mxu1 %vm2429_vm1, %v2428_v11  ;;  %v2719_v59 = vpop.f32.mrb[24].mxu0 }
 0x25d   :  { %2202 = vmatprep.subr.bf16.mxu1 %v2428_v11  ;;  %v2174_v61 = vpop.f32.mrb[25].mxu0  ;;  %v654_v0 = vadd.f32 %v652_v42, %v2719_v59 }
 0x25e   :  { %v471_v62 = vpop.f32.mrb[26].mxu0  ;;  %v653_v61 = vadd.f32 %v652_v42, %v2689_v44  ;;  %v718_v44 = vld [vmem:[%s2991_s5 + $0x48] sm:$0xff] }
 0x25f   :  { %v2175_v63 = vpop.f32.mrb[27].mxu0 }
 0x260   :  { %2203 = vmatpush3.bf16.msra.mxu1 %v2407_v49  ;;  %v655_v49 = vadd.f32 %v652_v42, %v471_v62 }
 0x261   :  { %2208 = vmatprep.subr.bf16.mxu1 %v2428_v11 }
 0x263   :  { %2205 = vmatmul.mubr.msk.bf16.vlgmr.msra.gmra.mrb[20].mxu1 %vm530_vm4, %v739_v10 }
 0x264   :  { %2209 = vmatpush3.bf16.msra.mxu1 %v2408_v50  ;;  %2212 = vmatprep.mubr.msk.bf16.mxu1 %vm2429_vm1, %v2428_v11  ;;  %v2754_v26 = vpop.f32.mrb[28].mxu0 }
 0x265   :  { %2210 = vmatprep.subr.bf16.mxu1 %v2428_v11  ;;  %v2178_v27 = vpop.f32.mrb[29].mxu0 }
 0x266   :  { %v2756_v28 = vpop.f32.mrb[30].mxu0 }
 0x267   :  { %v2179_v29 = vpop.f32.mrb[31].mxu0 }
 0x268   :  { %2211 = vmatpush3.bf16.msra.mxu1 %v2409_v53 }
 0x269   :  { %2224 = vmatprep.subr.bf16.mxu1 %v2414_v2 }
 0x26c   :  { %v2758_v30 = vpop.f32.mrb[32].mxu0 }
 0x26d   :  { %v2182_v32 = vpop.f32.mrb[33].mxu0 }
 0x26e   :  { %v487_v33 = vpop.f32.mrb[34].mxu0  ;;  %v2419_v32 = vld [vmem:[%s2992_s6 + $0x58] sm:$0xff]  }
 0x26f   :  { %v2183_v34 = vpop.f32.mrb[35].mxu0 }
 0x2b6   :  { %v568_v6 = vpop.f32.mrb[12].mxu1 }
 0x2b7   :  { %v656_v7 = vadd.f32 %v647_v3, %v568_v6  ;;  %681 = vrot.lane.b32.xlu0 %v568_v6, %s2430_s0  ;;  %v2190_v8 = vpop.f32.mrb[13].mxu1 }
 0x2b8   :  { %v571_v10 = vpop.f32.mrb[14].mxu1 }
 0x2b9   :  { %v661_v12 = vmax.f32 %v656_v7, 0.0  ;;  %v657_v13 = vadd.f32 %v648_v5, %v571_v10  ;;  %683 = vrot.lane.b32.xlu1 %v571_v10, %s2430_s0  ;;  %v2191_v15 = vpop.f32.mrb[15].mxu1  ;;  %v717_v7 = vld [vmem:[%s2991_s5 + $0x40] sm:$0xff] }
 0x2ba   :  { %v720_v15 = vld [vmem:[%s2991_s5 + $0x58] sm:$0xff] }
 0x2bb   :  { %v726_v17 = vmul.f32 %v711_v9, %v661_v12  ;;  %v662_v19 = vmax.f32 %v657_v13, 0.0  ;;  %v2417_v13 = vld [vmem:[%s2992_s6 + $0x48] sm:$0xff]  }
 0x2bd   :  { %v727_v23 = vmul.f32 %v712_v14, %v662_v19  ;;  %v719_v14 = vld [vmem:[%s2991_s5 + $0x50] sm:$0xff] }
 0x2bf   :  { %v740_v24 = vpack.c.bf16 %v727_v23, %v726_v17  ;;  %v732_v17 = vmul.f32 %v717_v7, %v2691_v45 }
 0x2c1   :  { %2213 = vmatmul.mubr.msk.bf16.vlgmr.msra.gmra.mrb[24].mxu1 %vm530_vm4, %v740_v24 }
 0x2c2   :  { %2228 = vmatprep.mubr.msk.bf16.mxu1 %vm530_vm4, %v742_v41  ;;  %2225 = vmatpush3.bf16.msra.mxu1 %v2414_v2  ;;  %v670_v41 = vadd.f32 %v669_v35, %v2656_v16  ;;  %v714_v16 = vld [vmem:[%s2991_s5 + $0x28] sm:$0xff] }
 0x2c3   :  { %2226 = vmatprep.subr.bf16.mxu1 %v2415_v25 }
 0x2c6   :  { %2227 = vmatpush3.bf16.msra.mxu1 %v2415_v25 }
 0x2c7   :  { %2240 = vmatprep.subr.bf16.mxu1 %v2418_v39 }
 0x329   :  { %v682_v43 = vpop.permute.xlu0 %681 }
 0x32a   :  { %v687_v47 = vadd.f32 %v682_v43, %v670_v41 }
 0x32b   :  { %v684_v48 = vpop.permute.xlu1 %683 }
 0x32c   :  { %v704_v50 = vmax.f32 %v687_v47, 0.0  ;;  %v688_v53 = vadd.f32 %v684_v48, %v671_v46 }
 0x32e   :  { %v705_v63 = vmax.f32 %v688_v53, 0.0  ;;  %v2198_v1 = vpop.f32.mrb[16].mxu1  ;;  %v728_v3 = vmul.f32 %v713_v60, %v704_v50  ;;  %v674_v50 = vsub.s32 5, %v2617_v54 }
 0x32f   :  { %v660_v18 = vadd.f32 %v2198_v1, %v655_v49  ;;  %v629_v2 = vpop.f32.mrb[17].mxu1 }
 0x330   :  { %v729_v62 = vmul.f32 %v714_v16, %v705_v63  ;;  %v658_v5 = vadd.f32 %v653_v61, %v629_v2  ;;  %692 = vrot.lane.b32.xlu0 %v629_v2, %s2430_s0  ;;  %v2199_v6 = vpop.f32.mrb[18].mxu1  ;;  %v675_v53 = vrot.slane %v2628_v57, %v674_v50 }
 0x331   :  { %v632_v8 = vpop.f32.mrb[19].mxu1  ;;  %v665_v59 = vmax.f32 %v660_v18, 0.0 }
 0x332   :  { %v741_v9 = vpack.c.bf16 %v729_v62, %v728_v3  ;;  %v663_v10 = vmax.f32 %v658_v5, 0.0  ;;  %v659_v12 = vadd.f32 %v654_v0, %v632_v8  ;;  %694 = vrot.lane.b32.xlu1 %v632_v8, %s2430_s0  ;;  %v676_v60 = vadd.f32 %v675_v53, %v2754_v26  ;;  %v721_v3 = vld [vmem:[%s2991_s5 + $0x60] sm:$0xff]  ;;  %v722_v62 = vld [vmem:[%s2991_s5 + $0x68] sm:$0xff] }
 0x333   :  { %v735_v24 = vmul.f32 %v720_v15, %v665_v59  ;;  %v677_v61 = vadd.f32 %v675_v53, %v2756_v28  ;;  %v678_v63 = vadd.f32 %v675_v53, %v2758_v30  ;;  %v723_v28 = vld [vmem:[%s2991_s5 + $0x70] sm:$0xff] }
 0x334   :  { %v733_v19 = vmul.f32 %v718_v44, %v663_v10  ;;  %v664_v23 = vmax.f32 %v659_v12, 0.0  ;;  %2221 = vmatmul.mubr.msk.bf16.vlgmr.msra.gmra.mrb[36].mxu0 %vm530_vm4, %v741_v9  ;;  %696 = vrot.lane.b32.xlu0 %v2198_v1, %s2430_s0  ;;  %s2431_s0 = smov 112  }
 0x335   :  { %2233 = vmatpush3.bf16.msra.mxu0 %v2737_v4 }
 0x336   :  { %v743_v25 = vpack.c.bf16 %v733_v19, %v732_v17  ;;  %v734_v27 = vmul.f32 %v719_v14, %v664_v23  ;;  %v820_v29 = vpop.f32.mrb[20].mxu1  ;;  %2234 = vmatprep.subr.bf16.mxu0 %v2417_v13 }
 0x337   :  { %v2206_v33 = vpop.f32.mrb[21].mxu1 }
 0x338   :  { %v744_v34 = vpack.c.bf16 %v735_v24, %v734_v27  ;;  %v823_v45 = vpop.f32.mrb[22].mxu1  ;;  %2229 = vmatmul.mubr.msk.bf16.vlgmr.msra.gmra.mrb[28].mxu1 %vm530_vm4, %v743_v25  ;;  %v1008_v4 = vrot.slane %v743_v25, 4 }
 0x339   :  { %v1143_v35 = vpack.c.bf16 %v823_v45, %v820_v29  ;;  %v2207_v41 = vpop.f32.mrb[23].mxu1  ;;  %2235 = vmatpush3.bf16.msra.mxu0 %v2417_v13  ;;  %2241 = vmatpush3.bf16.msra.mxu1 %v2418_v39 }
 0x33a   :  { %v1009_v42 = vrot.slane %v744_v34, 4  ;;  %2248 = vmatprep.subr.bf16.mxu0 %v2428_v11  ;;  %2242 = vmatprep.subr.bf16.mxu1 %v2419_v32 }
 0x33b   :  { %1219 = vrot.lane.b32.xlu1 %v1143_v35, %s2431_s0 }
 0x33c   :  { %v1010_v43 = vsel %vm285_vm2, %v1008_v4, %v1009_v42 }
 0x33d   :  { %2236 = vmatprep.mubr.msk.bf16.mxu0 %vm530_vm4, %v1010_v43  ;;  %2243 = vmatpush3.bf16.msra.mxu1 %v2419_v32 }
 0x33e   :  { %2237 = vmatmul.mubr.msk.bf16.vlgmr.msra.gmra.mrb[40].mxu0 %vm530_vm4, %v1009_v42  ;;  %2276 = vmatprep.subr.bf16.mxu1 %v2428_v11 }
 0x33f   :  { %2249 = vmatpush3.bf16.msra.mxu0 %v1143_v35  ;;  %2264 = vmatprep.mubr.msk.bf16.mxu0 %vm2429_vm1, %v2428_v11 }
 0x340   :  { %2250 = vmatprep.subr.bf16.mxu0 %v2428_v11 }
 0x394   :  { %v876_v39 = vpop.f32.mrb[24].mxu1 }
 0x395   :  { %v2214_v46 = vpop.f32.mrb[25].mxu1 }
 0x396   :  { %v879_v47 = vpop.f32.mrb[26].mxu1 }
 0x397   :  { %v1144_v48 = vpack.c.bf16 %v879_v47, %v876_v39  ;;  %v2215_v49 = vpop.f32.mrb[27].mxu1 }
 0x399   :  { %1221 = vrot.lane.b32.xlu0 %v1144_v48, %s2431_s0  ;;  %2251 = vmatpush3.bf16.msra.mxu0 %v1144_v48 }
 0x39a   :  { %2252 = vmatprep.subr.bf16.mxu0 %v2428_v11 }
 0x3a2   :  { %v693_v16 = vpop.permute.xlu0 %692 }
 0x3a3   :  { %v701_v0 = vadd.f32 %v693_v16, %v676_v60  ;;  %v2420_v16 = vld [vmem:[%s2993_s7] sm:$0xff]  }
 0x3a4   :  { %v695_v1 = vpop.permute.xlu1 %694 }
 0x3a5   :  { %v706_v18 = vmax.f32 %v701_v0, 0.0  ;;  %v702_v2 = vadd.f32 %v695_v1, %v677_v61 }
 0x3a6   :  { %v697_v57 = vpop.permute.xlu0 %696 }
 0x3a7   :  { %v707_v5 = vmax.f32 %v702_v2, 0.0  ;;  %v703_v26 = vadd.f32 %v697_v57, %v678_v63  ;;  %v736_v30 = vmul.f32 %v721_v3, %v706_v18 }
 0x3a9   :  { %v737_v6 = vmul.f32 %v722_v62, %v707_v5  ;;  %v708_v7 = vmax.f32 %v703_v26, 0.0 }
 0x3ab   :  { %v745_v44 = vpack.c.bf16 %v737_v6, %v736_v30  ;;  %v738_v8 = vmul.f32 %v723_v28, %v708_v7 }
 0x3ad   :  { %v746_v9 = vpack.c.bf16 %v738_v8, %v738_v8  ;;  %2244 = vmatprep.mubr.msk.bf16.mxu1 %vm530_vm4, %v745_v44  ;;  %v1220_v59 = vpop.permute.xlu1 %1219 }
 0x3af   :  { %2245 = vmatmul.mubr.msk.bf16.vlgmr.msra.gmra.mrb[32].mxu1 %vm530_vm4, %v746_v9 }
 0x3b0   :  { %2277 = vmatpush3.bf16.msra.mxu1 %v1220_v59  ;;  %2292 = vmatprep.mubr.msk.bf16.mxu1 %vm2429_vm1, %v2428_v11 }
 0x3b1   :  { %2278 = vmatprep.subr.bf16.mxu1 %v2428_v11 }
 0x407   :  { %v932_v10 = vpop.f32.mrb[36].mxu0 }
 0x408   :  { %v2222_v12 = vpop.f32.mrb[37].mxu0 }
 0x409   :  { %v935_v13 = vpop.f32.mrb[38].mxu0 }
 0x40a   :  { %v1145_v15 = vpack.c.bf16 %v935_v13, %v932_v10  ;;  %v2223_v14 = vpop.f32.mrb[39].mxu0 }
 0x40b   :  { %v2230_v17 = vpop.f32.mrb[28].mxu1  ;;  %v1222_v19 = vpop.permute.xlu0 %1221 }
 0x40c   :  { %1223 = vrot.lane.b32.xlu1 %v1145_v15, %s2431_s0  ;;  %2253 = vmatpush3.bf16.msra.mxu0 %v1145_v15  ;;  %v991_v23 = vpop.f32.mrb[29].mxu1 }
 0x40d   :  { %v2231_v24 = vpop.f32.mrb[30].mxu1  ;;  %2254 = vmatprep.subr.bf16.mxu0 %v2428_v11  ;;  %2279 = vmatpush3.bf16.msra.mxu1 %v1222_v19 }
 0x40e   :  { %v994_v25 = vpop.f32.mrb[31].mxu1  ;;  %2280 = vmatprep.subr.bf16.mxu1 %v2428_v11 }
 0x40f   :  { %v1146_v27 = vpack.c.bf16 %v994_v25, %v991_v23 }
 0x411   :  { %1225 = vrot.lane.b32.xlu0 %v1146_v27, %s2431_s0  ;;  %v2238_v29 = vpop.f32.mrb[40].mxu0  ;;  %2255 = vmatpush3.bf16.msra.mxu0 %v1146_v27 }
 0x412   :  { %v1063_v32 = vpop.f32.mrb[41].mxu0  ;;  %2256 = vmatprep.subr.bf16.mxu0 %v2428_v11 }
 0x413   :  { %v1147_v33 = vpack.c.bf16 %v1063_v32, %v2230_v17  ;;  %v2239_v34 = vpop.f32.mrb[42].mxu0 }
 0x414   :  { %v1066_v45 = vpop.f32.mrb[43].mxu0 }
 0x415   :  { %v1148_v35 = vpack.c.bf16 %v2238_v29, %v1066_v45  ;;  %1227 = vrot.lane.b32.xlu1 %v1147_v33, %s2431_s0  ;;  %2257 = vmatpush3.bf16.msra.mxu0 %v1147_v33 }
 0x416   :  { %2258 = vmatprep.subr.bf16.mxu0 %v2428_v11 }
 0x417   :  { %1229 = vrot.lane.b32.xlu0 %v1148_v35, %s2431_s0 }
 0x419   :  { %2259 = vmatpush3.bf16.msra.mxu0 %v1148_v35 }
 0x41a   :  { %2260 = vmatprep.subr.bf16.mxu0 %v2428_v11 }
 0x47e   :  { %v1224_v41 = vpop.permute.xlu1 %1223 }
 0x47f   :  { %2281 = vmatpush3.bf16.msra.mxu1 %v1224_v41  ;;  %v2423_v41 = vld [vmem:[%s2995_s9 + $0x8] sm:$0xff]  }
 0x480   :  { %2282 = vmatprep.subr.bf16.mxu1 %v2428_v11 }
 0x482   :  { %v2246_v42 = vpop.f32.mrb[32].mxu1 }
 0x483   :  { %v1150_v4 = vpack.c.bf16 %v2246_v42, %v2246_v42  ;;  %v1226_v43 = vpop.permute.xlu0 %1225  ;;  %v1129_v39 = vpop.f32.mrb[33].mxu1 }
 0x484   :  { %v2247_v46 = vpop.f32.mrb[34].mxu1  ;;  %2283 = vmatpush3.bf16.msra.mxu1 %v1226_v43 }
 0x485   :  { %v1132_v47 = vpop.f32.mrb[35].mxu1  ;;  %1233 = vrot.lane.b32.xlu0 %v1150_v4, %s2431_s0  ;;  %2284 = vmatprep.subr.bf16.mxu1 %v2428_v11  ;;  %v1152_v53 = vsel %vm285_vm2, %v1150_v4, 0  ;;  %v2424_v4 = vld [vmem:[%s2995_s9 + $0x18] sm:$0xff]  }
 0x486   :  { %v1149_v48 = vpack.c.bf16 %v1132_v47, %v1129_v39 }
 0x487   :  { %v1228_v49 = vpop.permute.xlu1 %1227 }
 0x488   :  { %1231 = vrot.lane.b32.xlu1 %v1149_v48, %s2431_s0  ;;  %2261 = vmatpush3.bf16.msra.mxu0 %v1149_v48 }
 0x489   :  { %2285 = vmatpush3.bf16.msra.mxu1 %v1228_v49  ;;  %2262 = vmatprep.subr.bf16.mxu0 %v2428_v11  ;;  %v1230_v60 = vpop.permute.xlu0 %1229 }
 0x48a   :  { %2286 = vmatprep.subr.bf16.mxu1 %v2428_v11 }
 0x48c   :  { %2263 = vmatpush3.bf16.msra.mxu0 %v1152_v53 }
 0x48d   :  { %2287 = vmatpush3.bf16.msra.mxu1 %v1230_v60  ;;  %2312 = vmatprep.subr.bf16.mxu0 %v2428_v11 }
 0x48e   :  { %2288 = vmatprep.subr.bf16.mxu1 %v2428_v11 }
 0x48f   :  { %2265 = vmatmul.mubr.msk.bf16.vlgmr.msra.gmra.mrb[44].mxu0 %vm275_vm3, %v2558_v37 }
 0x490   :  { %2268 = vmatprep.mubr.msk.bf16.mxu0 %vm2429_vm1, %v2428_v11  ;;  %2313 = vmatpush3.bf16.msra.mxu0 %v2420_v16 }
 0x497   :  { %2269 = vmatmul.mubr.msk.bf16.gmra.mrb[48].mxu0 %vm275_vm3, %v2568_v38 }
 0x498   :  { %2272 = vmatprep.mubr.msk.bf16.mxu0 %vm2429_vm1, %v2428_v11 }
 0x49f   :  { %2273 = vmatmul.mubr.msk.bf16.gmra.mrb[52].mxu0 %vm275_vm3, %v2577_v40  ;;  %v2894_v40 = vld [vmem:[%s2994_s8] sm:$0x3f] }
 0x4a0   :  { %2314 = vmatprep.mubr.msk.bf16.mxu0 %vm2429_vm1, %v2428_v11  ;;  %v1329_v44 = vrot.slane %v2894_v40, %v501_v21  ;;  %v2422_v21 = vld [vmem:[%s2995_s9] sm:$0xff]   ;;  %v1457_v42 = vrot.slane %v2894_v40, %v2717_v55 }
 0x4f7   :  { %v1234_v61 = vpop.permute.xlu0 %1233 }
 0x4f8   :  { %v1243_v38 = vsel %vm285_vm2, %v1234_v61, 0  ;;  %v2425_v61 = vld [vmem:[%s2995_s9 + $0x20] sm:$0xff]  }
 0x4fa   :  { %v1232_v37 = vpop.permute.xlu1 %1231 }
 0x4fb   :  { %2289 = vmatpush3.bf16.msra.mxu1 %v1232_v37 }
 0x4fc   :  { %2290 = vmatprep.subr.bf16.mxu1 %v2428_v11 }
 0x4ff   :  { %2291 = vmatpush3.bf16.msra.mxu1 %v1243_v38 }
 0x500   :  { %2330 = vmatprep.subr.bf16.mxu1 %v2424_v4 }
 0x502   :  { %2293 = vmatmul.mubr.msk.bf16.vlgmr.msra.gmra.mrb[36].mxu1 %vm275_vm3, %v2601_v51  ;;  %v2421_v51 = vld [vmem:[%s2993_s7 + $0x8] sm:$0xff]  }
 0x503   :  { %2296 = vmatprep.mubr.msk.bf16.mxu1 %vm2429_vm1, %v2428_v11  ;;  %2318 = vmatprep.subr.bf16.mxu0 %v2421_v51 }
 0x504   :  { %2331 = vmatpush3.bf16.msra.mxu1 %v2424_v4 }
 0x505   :  { %2342 = vmatprep.subr.bf16.mxu1 %v2425_v61 }
 0x50a   :  { %2297 = vmatmul.mubr.msk.bf16.gmra.mrb[40].mxu1 %vm275_vm3, %v2611_v52  ;;  %v1321_v52 = vrot.slane %v2894_v40, %v2623_v56 }
 0x50b   :  { %2300 = vmatprep.mubr.msk.bf16.mxu1 %vm2429_vm1, %v2428_v11 }
 0x512   :  { %2301 = vmatmul.mubr.msk.bf16.gmra.mrb[44].mxu1 %vm275_vm3, %v2633_v58 }
 0x513   :  { %2304 = vmatprep.mubr.msk.bf16.mxu1 %vm2429_vm1, %v2428_v11 }
 0x51a   :  { %2305 = vmatmul.mubr.msk.bf16.gmra.mrb[48].mxu1 %vm275_vm3, %v2663_v20 }
 0x51b   :  { %2308 = vmatprep.mubr.msk.bf16.mxu1 %vm2429_vm1, %v2428_v11 }
 0x522   :  { %2309 = vmatmul.mubr.msk.bf16.gmra.mrb[52].mxu1 %vm275_vm3, %v2673_v22 }
 0x562   :  { %v1188_v58 = vpop.f32.mrb[44].mxu0 }
 0x563   :  { %v1322_v20 = vadd.f32 %v1321_v52, %v1188_v58  ;;  %v2266_v63 = vpop.f32.mrb[45].mxu0 }
 0x564   :  { %v1191_v0 = vpop.f32.mrb[46].mxu0 }
 0x565   :  { %v1324_v1 = vmax.f32 %v1322_v20, 0.0  ;;  %v1323_v18 = vadd.f32 %v1321_v52, %v1191_v0  ;;  %v2267_v22 = vpop.f32.mrb[47].mxu0 }
 0x566   :  { %v2427_v22 = vld [vmem:[%s2995_s9 + $0x10] sm:$0xff]  }
 0x567   :  { %v1325_v2 = vmax.f32 %v1323_v18, 0.0 }
 0x569   :  { %v1340_v3 = vpack.c.bf16 %v1325_v2, %v1324_v1  ;;  %v1463_v2 = vrot.slane %v2894_v40, %v651_v36 }
 0x56a   :  { %v1196_v62 = vpop.f32.mrb[48].mxu0 }
 0x56b   :  { %2315 = vmatmul.mubr.msk.bf16.vlgmr.msra.gmra.mrb[56].mxu0 %vm1347_vm5, %v1340_v3  ;;  %v2270_v57 = vpop.f32.mrb[49].mxu0  ;;  %v1458_v43 = vadd.f32 %v1457_v42, %v1196_v62 }
 0x56c   :  { %2319 = vmatpush3.bf16.msra.mxu0 %v2421_v51  ;;  %v1199_v5 = vpop.f32.mrb[50].mxu0 }
 0x56d   :  { %2324 = vmatprep.subr.bf16.mxu0 %v2428_v11  ;;  %v2271_v26 = vpop.f32.mrb[51].mxu0  ;;  %v1459_v39 = vadd.f32 %v1457_v42, %v1199_v5 }
 0x572   :  { %v2903_v28 = vpop.f32.mrb[52].mxu0 }
 0x573   :  { %v2274_v30 = vpop.f32.mrb[53].mxu0 }
 0x574   :  { %v2905_v6 = vpop.f32.mrb[54].mxu0 }
 0x575   :  { %v2275_v7 = vpop.f32.mrb[55].mxu0 }
 0x5d5   :  { %v1279_v8 = vpop.f32.mrb[36].mxu1 }
 0x5d6   :  { %v1330_v9 = vadd.f32 %v1329_v44, %v1279_v8  ;;  %v2294_v59 = vpop.f32.mrb[37].mxu1 }
 0x5d7   :  { %v1282_v10 = vpop.f32.mrb[38].mxu1 }
 0x5d8   :  { %v1331_v12 = vadd.f32 %v1329_v44, %v1282_v10  ;;  %v2295_v13 = vpop.f32.mrb[39].mxu1  ;;  %v1333_v15 = vmax.f32 %v1330_v9, 0.0 }
 0x5da   :  { %v1334_v14 = vmax.f32 %v1331_v12, 0.0  ;;  %v2426_v12 = vld [vmem:[%s2995_s9 + $0x28] sm:$0xff]  }
 0x5dc   :  { %v1392_v17 = vpack.c.bf16 %v1334_v14, %v1333_v15 }
 0x5dd   :  { %v1287_v19 = vpop.f32.mrb[40].mxu1 }
 0x5de   :  { %v1332_v23 = vadd.f32 %v1329_v44, %v1287_v19  ;;  %v2298_v24 = vpop.f32.mrb[41].mxu1  ;;  %2320 = vmatprep.mubr.msk.bf16.mxu0 %vm1347_vm5, %v1392_v17  ;;  %2332 = vmatprep.mubr.msk.bf16.mxu1 %vm1347_vm5, %v1392_v17  ;;  %v1486_v19 = vrot.slane %v2894_v40, %v674_v50 }
 0x5df   :  { %v1290_v25 = vpop.f32.mrb[42].mxu1 }
 0x5e0   :  { %v1335_v27 = vmax.f32 %v1332_v23, 0.0  ;;  %v2299_v29 = vpop.f32.mrb[43].mxu1  ;;  %v1464_v62 = vadd.f32 %v1463_v2, %v1290_v25  ;;  %v1480_v25 = vrot.slane %v2894_v40, %v668_v31 }
 0x5e2   :  { %v1393_v32 = vpack.c.bf16 %v1335_v27, %v1335_v27  ;;  %v1482_v4 = vadd.f32 %v1480_v25, %v2905_v6 }
 0x5e4   :  { %2321 = vmatmul.mubr.msk.bf16.vlgmr.msra.gmra.mrb[60].mxu0 %vm1347_vm5, %v1393_v32 }
 0x5e5   :  { %2325 = vmatpush3.bf16.msra.mxu0 %v2422_v21  ;;  %2326 = vmatprep.mubr.msk.bf16.mxu0 %vm2429_vm1, %v2428_v11  ;;  %v1295_v33 = vpop.f32.mrb[44].mxu1 }
 0x5e6   :  { %2336 = vmatprep.subr.bf16.mxu0 %v2428_v11  ;;  %v2302_v34 = vpop.f32.mrb[45].mxu1 }
 0x5e7   :  { %v1298_v45 = vpop.f32.mrb[46].mxu1 }
 0x5e8   :  { %v2303_v35 = vpop.f32.mrb[47].mxu1 }
 0x5e9   :  { %v1481_v35 = vadd.f32 %v1480_v25, %v2903_v28  ;;  %v1538_v28 = vld [vmem:[%s2996_s10] sm:$0x3] }
 0x5ea   :  { %v1652_v6 = vrot.slane %v1538_v28, %v2717_v55 }
 0x5ec   :  { %2327 = vmatmul.mubr.msk.bf16.vlgmr.msra.gmra.mrb[64].mxu0 %vm1347_vm5, %v1340_v3  ;;  %v1466_v3 = vadd.f32 %v1463_v2, %v1298_v45 }
 0x5ed   :  { %2337 = vmatpush3.bf16.msra.mxu0 %v2423_v41  ;;  %2338 = vmatprep.mubr.msk.bf16.mxu0 %vm2429_vm1, %v2428_v11  ;;  %v1303_v51 = vpop.f32.mrb[48].mxu1 }
 0x5ee   :  { %2348 = vmatprep.subr.bf16.mxu0 %v2428_v11  ;;  %v2306_v52 = vpop.f32.mrb[49].mxu1  ;;  %v1487_v21 = vadd.f32 %v1486_v19, %v1303_v51 }
 0x5ef   :  { %v1306_v58 = vpop.f32.mrb[50].mxu1 }
 0x5f0   :  { %v2307_v20 = vpop.f32.mrb[51].mxu1 }
 0x5f5   :  { %v1311_v63 = vpop.f32.mrb[52].mxu1 }
 0x5f6   :  { %v2310_v0 = vpop.f32.mrb[53].mxu1  ;;  %v1489_v23 = vadd.f32 %v1486_v19, %v1311_v63 }
 0x5f7   :  { %v1314_v1 = vpop.f32.mrb[54].mxu1 }
 0x5f8   :  { %v2311_v18 = vpop.f32.mrb[55].mxu1 }
 0x63e   :  { %v1385_v46 = vpop.f32.mrb[56].mxu0 }
 0x63f   :  { %v1467_v47 = vadd.f32 %v1458_v43, %v1385_v46  ;;  %v2316_v48 = vpop.f32.mrb[57].mxu0 }
 0x640   :  { %v1388_v49 = vpop.f32.mrb[58].mxu0 }
 0x641   :  { %v1472_v53 = vmax.f32 %v1467_v47, 0.0  ;;  %v1468_v60 = vadd.f32 %v1459_v39, %v1388_v49  ;;  %v2317_v16 = vpop.f32.mrb[59].mxu0 }
 0x643   :  { %v1473_v37 = vmax.f32 %v1468_v60, 0.0  ;;  %v1589_v60 = vrot.slane %v1538_v28, %v2623_v56 }
 0x645   :  { %v1520_v38 = vpack.c.bf16 %v1473_v37, %v1472_v53 }
 0x647   :  { %2339 = vmatmul.mubr.msk.bf16.vlgmr.msra.gmra.mrb[64].mxu0 %vm1347_vm5, %v1520_v38 }
 0x648   :  { %2350 = vmatprep.mubr.msk.bf16.mxu0 %vm2429_vm1, %v2428_v11  ;;  %2349 = vmatpush3.bf16.msra.mxu0 %v2427_v22  ;;  %v1465_v11 = vadd.f32 %v1463_v2, %v1295_v33 }
 0x6b7   :  { %v2322_v57 = vpop.f32.mrb[60].mxu0 }
 0x6b8   :  { %v1471_v5 = vadd.f32 %v2322_v57, %v1466_v3  ;;  %1507 = vrot.lane.b32.xlu1 %v2322_v57, %s2431_s0  ;;  %v1440_v26 = vpop.f32.mrb[61].mxu0 }
 0x6b9   :  { %v1469_v30 = vadd.f32 %v1464_v62, %v1440_v26  ;;  %v2323_v7 = vpop.f32.mrb[62].mxu0 }
 0x6ba   :  { %v1443_v44 = vpop.f32.mrb[63].mxu0  ;;  %v1476_v59 = vmax.f32 %v1471_v5, 0.0 }
 0x6bb   :  { %v1474_v8 = vmax.f32 %v1469_v30, 0.0  ;;  %v1470_v9 = vadd.f32 %v1465_v11, %v1443_v44  ;;  %1505 = vrot.lane.b32.xlu0 %v1443_v44, %s2431_s0 }
 0x6bc   :  { %1503 = vrot.lane.b32.xlu1 %v1440_v26, %s2431_s0 }
 0x6bd   :  { %v1522_v36 = vpack.c.bf16 %v1474_v8, %v1335_v27  ;;  %v1475_v10 = vmax.f32 %v1470_v9, 0.0  ;;  %v1488_v27 = vadd.f32 %v1486_v19, %v1306_v58 }
 0x6bf   :  { %v1523_v13 = vpack.c.bf16 %v1476_v59, %v1475_v10  ;;  %2333 = vmatmul.mubr.msk.bf16.vlgmr.msra.gmra.mrb[56].mxu1 %vm1347_vm5, %v1522_v36  ;;  %1492 = vrot.lane.b32.xlu0 %v1385_v46, %s2431_s0  ;;  %v1710_v15 = vrot.slane %v1522_v36, 4 }
 0x6c0   :  { %1494 = vrot.lane.b32.xlu1 %v1388_v49, %s2431_s0  ;;  %2343 = vmatpush3.bf16.msra.mxu1 %v2425_v61 }
 0x6c1   :  { %v1711_v14 = vrot.slane %v1523_v13, 4  ;;  %2354 = vmatprep.subr.bf16.mxu1 %v2426_v12 }
 0x6c3   :  { %v1712_v17 = vsel %vm285_vm2, %v1710_v15, %v1711_v14 }
 0x6c4   :  { %2344 = vmatprep.mubr.msk.bf16.mxu1 %vm1347_vm5, %v1712_v17 }
 0x6cb   :  { %2345 = vmatmul.mubr.msk.bf16.vlgmr.msra.gmra.mrb[56].mxu1 %vm1347_vm5, %v1711_v14 }
 0x6cc   :  { %2355 = vmatpush3.bf16.msra.mxu1 %v2426_v12 }
 0x72a   :  { %v1508_v24 = vpop.permute.xlu1 %1507 }
 0x72b   :  { %v1514_v29 = vadd.f32 %v1508_v24, %v1489_v23 }
 0x72d   :  { %v1506_v32 = vpop.permute.xlu0 %1505  ;;  %v1519_v41 = vmax.f32 %v1514_v29, 0.0 }
 0x72e   :  { %v1513_v33 = vadd.f32 %v1506_v32, %v1488_v27  ;;  %v1504_v34 = vpop.permute.xlu1 %1503 }
 0x72f   :  { %v1512_v45 = vadd.f32 %v1504_v34, %v1487_v21  ;;  %v1525_v31 = vpack.c.bf16 %v1519_v41, %v1519_v41 }
 0x730   :  { %v1518_v42 = vmax.f32 %v1513_v33, 0.0 }
 0x731   :  { %v1517_v50 = vmax.f32 %v1512_v45, 0.0  ;;  %v1493_v43 = vpop.permute.xlu0 %1492 }
 0x732   :  { %v1498_v39 = vadd.f32 %v1493_v43, %v1481_v35  ;;  %v1495_v46 = vpop.permute.xlu1 %1494 }
 0x733   :  { %v1524_v54 = vpack.c.bf16 %v1518_v42, %v1517_v50  ;;  %v1499_v47 = vadd.f32 %v1495_v46, %v1482_v4 }
 0x734   :  { %v1515_v40 = vmax.f32 %v1498_v39, 0.0 }
 0x735   :  { %v1516_v48 = vmax.f32 %v1499_v47, 0.0  ;;  %2356 = vmatprep.mubr.msk.bf16.mxu1 %vm1347_vm5, %v1524_v54 }
 0x736   :  { %2357 = vmatmul.mubr.msk.bf16.vlgmr.msra.gmra.mrb[56].mxu1 %vm1347_vm5, %v1525_v31 }
 0x737   :  { %v1521_v49 = vpack.c.bf16 %v1516_v48, %v1515_v40 }
 0x739   :  { %2351 = vmatmul.mubr.msk.bf16.vlgmr.msra.gmra.mrb[64].mxu0 %vm1347_vm5, %v1521_v49 }
 0x809   :  { %v2358_v53 = vpop.f32.mrb[56].mxu1 }
 0x80a   :  { %v2362_v16 = vadd.f32 %v2358_v53, %v1652_v6  ;;  %v1874_v37 = vpop.f32.mrb[57].mxu1 }
 0x80b   :  { %v2363_v61 = vadd.f32 %v1874_v37, %v1652_v6  ;;  %v2359_v38 = vpop.f32.mrb[58].mxu1 }
 0x80c   :  { %1895 = vst [vmem:[%s2997_s11 + $0x20] sm:$0xff] %v2362_v16  ;;  %v1819_v51 = vpop.f32.mrb[64].mxu0  ;;  %v1877_v52 = vpop.f32.mrb[59].mxu1 }
 0x80d   :  { %1893 = vst [vmem:[%s2997_s11 + $0x10] sm:$0xff] %v2363_v61  ;;  %v2360_v58 = vadd.f32 %v1819_v51, %v1589_v60  ;;  %v2364_v20 = vadd.f32 %v1877_v52, %v1652_v6  ;;  %v2352_v55 = vpop.f32.mrb[65].mxu0 }
 0x80e   :  { %v1822_v63 = vpop.f32.mrb[66].mxu0 }
 0x80f   :  { %1891 = vst [vmem:[%s2997_s11] sm:$0xff] %v2360_v58  ;;  %1894 = vst [vmem:[%s2997_s11 + $0x18] sm:$0xff] %v2364_v20  ;;  %v2361_v56 = vadd.f32 %v1822_v63, %v1589_v60  ;;  %v2353_v0 = vpop.f32.mrb[67].mxu0 }
 0x811   :  { %1892 = vst [vmem:[%s2997_s11 + $0x8] sm:$0xff] %v2361_v56 }

</bundles_post_ra>
